<compile_context>
chip_gen: v7x
topology: tpu7x:2x2x1
jax: 0.10.0
libtpu: 0.0.40
codegen_flags: <defaults>
</compile_context>

<pallas_src>
import jax
import jax.numpy as jnp
from jax import lax
from jax.experimental import pallas as pl
from jax.experimental.pallas import tpu as pltpu
import numpy as np

_LANE, _SUB = 128, 8


def _decoder_kernel(x_ref,                 # (T, Bt, Hp)  f32 input tile
                    wup_ref, bup_ref,      # (Hp, Cp) f32, (1, Cp) f32     Conv1d k=1
                    gamma_ref, beta_ref,   # (1, Cp) f32                   InstanceNorm affine
                    wru_ref, bru_ref,      # (Cp, 2Cp) bf16, (1, 2Cp) f32  [reset | update] packed
                    wp_ref, bp_ref,        # (Cp, Cp) bf16, (1, Cp) f32    proposed state
                    wo_ref, bo_ref,        # (Cp, Cp) bf16, (1, Cp) f32    reconstr
                    z_ref,                 # (T, Bt, Cp) f32 output (also hidden-state stash)
                    xru_ref,               # (T, Bt, 2Cp) bf16 scratch: r/u input projections
                    xp_ref):               # (T, Bt, Cp)  bf16 scratch: proposed input projection
    T, Bt, Hp = x_ref.shape
    Cp = z_ref.shape[-1]

    # ---- phase 1: upsample (Conv1d k=1) + InstanceNorm1d + ReLU (f32) -------
    x2d = x_ref[...].reshape(T * Bt, Hp)
    up = (jnp.dot(x2d, wup_ref[...], preferred_element_type=jnp.float32)
          + bup_ref[...]).reshape(T, Bt, Cp)
    inv_t = 1.0 / T
    mean = jnp.sum(up, axis=0, keepdims=True) * inv_t          # one-pass stats over time
    msq = jnp.sum(up * up, axis=0, keepdims=True) * inv_t
    var = msq - mean * mean
    y = (up - mean) * lax.rsqrt(var + 1e-5)
    y = y * gamma_ref[...][None] + beta_ref[...][None]
    y = jnp.maximum(y, 0.0)
    # Dropout: identity in inference mode.

    # ---- phase 2: batched input->hidden projections (bf16 MXU, bf16 scratch) -
    y2d = y.reshape(T * Bt, Cp).astype(jnp.bfloat16)
    xru = jnp.dot(y2d, wru_ref[...], preferred_element_type=jnp.float32) + bru_ref[...]
    xru_ref[...] = xru.reshape(T, Bt, 2 * Cp).astype(jnp.bfloat16)
    xp = jnp.dot(y2d, wp_ref[...], preferred_element_type=jnp.float32) + bp_ref[...]
    xp_ref[...] = xp.reshape(T, Bt, Cp).astype(jnp.bfloat16)

    # ---- phase 3: reverse-time recurrence (only h-dependent work remains) ----
    wru = wru_ref[...]        # bf16 weights, hoisted out of the loop
    wp = wp_ref[...]

    def step(s, h_prev):
        idx = T - 1 - s                                    # t = s+1 -> python index -t
        g = (xru_ref[idx].astype(jnp.float32)
             + jnp.dot(h_prev.astype(jnp.bfloat16), wru,
                       preferred_element_type=jnp.float32))
        r = jax.nn.sigmoid(g[:, :Cp])
        u = jax.nn.sigmoid(g[:, Cp:])
        h_hat = jnp.tanh(xp_ref[idx].astype(jnp.float32)
                         + jnp.dot((r * h_prev).astype(jnp.bfloat16), wp,
                                   preferred_element_type=jnp.float32))
        h = (1.0 - u) * h_prev + u * h_hat
        z_ref[idx] = h                                     # stash hidden state (f32)
        return h

    h0 = jnp.zeros((Bt, Cp), jnp.float32)                  # h_0 buffer (zeros)
    lax.fori_loop(0, T, step, h0, unroll=min(T, 8))        # bounded unroll

    # ---- phase 4: batched output projection (one MXU matmul, lane-dense store)
    h_all = z_ref[...].reshape(T * Bt, Cp).astype(jnp.bfloat16)
    z = jnp.dot(h_all, wo_ref[...], preferred_element_type=jnp.float32) + bo_ref[...]
    z_ref[...] = z.reshape(T, Bt, Cp)


def _round_up(n, m):
    return ((n + m - 1) // m) * m


def _vmem_capacity_bytes():
    try:
        info = pltpu.get_tpu_info()
        cap = getattr(info, "vmem_capacity_bytes", None)
        if cap:
            return int(cap)
    except Exception:
        pass
    return 64 * 1024 * 1024          # conservative fallback (v7x per-core size)


def _tile_vmem_bytes(bt, T, Hp, Cp):
    f32b, bf16b = 4, 2
    blk_in = 2 * T * bt * Hp * f32b                 # double-buffered input block
    blk_out = 2 * T * bt * Cp * f32b                # double-buffered output block
    scratch = T * bt * (3 * Cp) * bf16b             # bf16 xru (2Cp) + xp (Cp)
    temps = 6 * T * bt * Cp * f32b                  # live f32 temporaries (phases 1/2/4)
    weights = 2 * (Hp * Cp * f32b + 4 * Cp * Cp * bf16b + 7 * Cp * f32b)
    return blk_in + blk_out + scratch + temps + weights


def costum_rnn_decoder(x_bht, params, *, b_tile=None):
    """x_bht: (B, hidden_size, T) float32 (PyTorch NCL).  Returns (B, C, T) float32."""
    (wupT, bup, gamma, beta, wrT, br, wuT, bu, wpT, bp, woT, bo) = params
    B, H, T = x_bht.shape
    C = wupT.shape[1]

    Cp = _round_up(C, _LANE)
    Hp = _round_up(H, _LANE)
    Bp8 = _round_up(B, _SUB)

    vmem_cap = _vmem_capacity_bytes()
    limit_cap = int(0.75 * vmem_cap)                 # ~48 MiB on v7x, ~96 MiB on v5e/v6e
    tile_budget = min(vmem_cap // 2, 48 * 1024 * 1024)

    if b_tile is not None:
        Bt = _round_up(int(b_tile), _SUB)
    else:
        # largest batch tile (multiple of 8, <=128) whose working set fits the budget
        Bt = _SUB
        for cand in range(_SUB, min(128, Bp8) + 1, _SUB):
            if _tile_vmem_bytes(cand, T, Hp, Cp) <= tile_budget:
                Bt = cand
        # guarantee >= 2 grid tiles whenever the padded batch allows it, so the
        # "parallel" axis can shard across both v7x TensorCores and consecutive
        # tiles overlap DMA with compute
        if Bp8 >= 2 * _SUB and Bt >= Bp8:
            Bt = _round_up((Bp8 + 1) // 2, _SUB)
    Bt = max(_SUB, min(Bt, Bp8))
    Bp = _round_up(Bp8, Bt)

    f32, bf16 = jnp.float32, jnp.bfloat16

    # time-major, zero-padded input: (T, Bp, Hp); kept f32 for phase-1 parity
    x_tbh = jnp.transpose(x_bht.astype(f32), (2, 0, 1))
    x_tbh = jnp.pad(x_tbh, ((0, 0), (0, Bp - B), (0, Hp - H)))

    def pad2(w, r, c):
        w = jnp.asarray(w, f32)
        return jnp.pad(w, ((0, r - w.shape[0]), (0, c - w.shape[1])))

    wup_p = pad2(wupT, Hp, Cp)
    bup_p = pad2(bup, 1, Cp)
    gamma_p = pad2(gamma, 1, Cp)
    beta_p = pad2(beta, 1, Cp)
    # pack reset|update weights so the per-step hidden matmul is a single dot; bf16
    wru_bf = jnp.concatenate([pad2(wrT, Cp, Cp), pad2(wuT, Cp, Cp)], axis=1).astype(bf16)
    bru_p = jnp.concatenate([pad2(br, 1, Cp), pad2(bu, 1, Cp)], axis=1)      # (1, 2Cp) f32
    wp_bf = pad2(wpT, Cp, Cp).astype(bf16)
    bp_p = pad2(bp, 1, Cp)
    wo_bf = pad2(woT, Cp, Cp).astype(bf16)
    bo_p = pad2(bo, 1, Cp)

    grid = (Bp // Bt,)

    def full_spec(a):                        # constant (un-tiled) weight / bias
        return pl.BlockSpec(a.shape, lambda b: (0, 0))

    in_specs = [
        pl.BlockSpec((T, Bt, Hp), lambda b: (0, b, 0)),
        full_spec(wup_p), full_spec(bup_p), full_spec(gamma_p), full_spec(beta_p),
        full_spec(wru_bf), full_spec(bru_p), full_spec(wp_bf), full_spec(bp_p),
        full_spec(wo_bf), full_spec(bo_p),
    ]
    out_specs = pl.BlockSpec((T, Bt, Cp), lambda b: (0, b, 0))

    est = _tile_vmem_bytes(Bt, T, Hp, Cp)
    vmem_limit = int(min(max(2 * est, 16 * 1024 * 1024), limit_cap))

    z_pad = pl.pallas_call(
        _decoder_kernel,
        out_shape=jax.ShapeDtypeStruct((T, Bp, Cp), f32),
        grid=grid,
        in_specs=in_specs,
        out_specs=out_specs,
        scratch_shapes=[pltpu.VMEM((T, Bt, 2 * Cp), bf16),
                        pltpu.VMEM((T, Bt, Cp), bf16)],
        compiler_params=pltpu.CompilerParams(
            dimension_semantics=("parallel",),
            vmem_limit_bytes=vmem_limit),
    )(x_tbh, wup_p, bup_p, gamma_p, beta_p, wru_bf, bru_p, wp_bf, bp_p, wo_bf, bo_p)

    # strip padding (slice first so only logical-size data moves), (T, B, C) -> (B, C, T)
    return jnp.transpose(z_pad[:, :B, :C], (1, 2, 0))


def reference(x_bht, params):
    """Pure-JAX f32 reference mirroring the PyTorch forward (eval mode)."""
    (wupT, bup, gamma, beta, wrT, br, wuT, bu, wpT, bp, woT, bo) = params
    B, H, T = x_bht.shape
    up = jnp.einsum('bht,hc->bct', x_bht, wupT) + bup[0][None, :, None]
    mean = up.mean(axis=2, keepdims=True)
    var = ((up - mean) ** 2).mean(axis=2, keepdims=True)
    y = (up - mean) / jnp.sqrt(var + 1e-5)
    y = y * gamma[0][None, :, None] + beta[0][None, :, None]
    y = jnp.maximum(y, 0.0)
    C = wupT.shape[1]
    h = jnp.zeros((B, C), jnp.float32)
    z = jnp.zeros_like(y)
    for t in range(1, T + 1):
        x_t = y[:, :, -t]
        r = jax.nn.sigmoid((x_t + h) @ wrT + br)
        u = jax.nn.sigmoid((x_t + h) @ wuT + bu)
        h_hat = jnp.tanh((x_t + r * h) @ wpT + bp)
        h = (1.0 - u) * h + u * h_hat
        z = z.at[:, :, -t].set(h @ woT + bo)
    return z


def make_params(key, hidden_size, n_channels):
    ks = jax.random.split(key, 12)
    s = 0.2
    wupT = s * jax.random.normal(ks[0], (hidden_size, n_channels), jnp.float32)
    bup = s * jax.random.normal(ks[1], (1, n_channels), jnp.float32)
    gamma = 1.0 + 0.1 * jax.random.normal(ks[2], (1, n_channels), jnp.float32)
    beta = 0.1 * jax.random.normal(ks[3], (1, n_channels), jnp.float32)
    wrT = s * jax.random.normal(ks[4], (n_channels, n_channels), jnp.float32)
    br = s * jax.random.normal(ks[5], (1, n_channels), jnp.float32)
    wuT = s * jax.random.normal(ks[6], (n_channels, n_channels), jnp.float32)
    bu = s * jax.random.normal(ks[7], (1, n_channels), jnp.float32)
    wpT = s * jax.random.normal(ks[8], (n_channels, n_channels), jnp.float32)
    bp = s * jax.random.normal(ks[9], (1, n_channels), jnp.float32)
    woT = s * jax.random.normal(ks[10], (n_channels, n_channels), jnp.float32)
    bo = s * jax.random.normal(ks[11], (1, n_channels), jnp.float32)
    return (wupT, bup, gamma, beta, wrT, br, wuT, bu, wpT, bp, woT, bo)


if __name__ == "__main__":
    B, hidden_size, n_channels, n_time_samples = 2, 4, 16, 8

    key = jax.random.PRNGKey(0)
    kx, kp = jax.random.split(key)
    x = jax.random.normal(kx, (B, hidden_size, n_time_samples), jnp.float32)
    params = make_params(kp, hidden_size, n_channels)

    z = costum_rnn_decoder(x, params)
    z = jax.block_until_ready(z)

    z_ref = jax.block_until_ready(reference(x, params))
    # bf16 operands on the projection / recurrence MXU matmuls -> loosened tolerance
    np.testing.assert_allclose(np.asarray(z), np.asarray(z_ref), rtol=3e-2, atol=3e-2)
    assert z.shape == (B, n_channels, n_time_samples)

    print("KERNEL_OK")
</pallas_src>

<mosaic_0001>
module attributes {stable_mosaic.version = 11 : i64} {
  func.func @_decoder_kernel(%arg0: i32, %arg1: memref<8x8x128xf32, #tpu.memory_space<vmem>>, %arg2: memref<128x128xf32, #tpu.memory_space<vmem>>, %arg3: memref<1x128xf32, #tpu.memory_space<vmem>>, %arg4: memref<1x128xf32, #tpu.memory_space<vmem>>, %arg5: memref<1x128xf32, #tpu.memory_space<vmem>>, %arg6: memref<128x256xbf16, #tpu.memory_space<vmem>>, %arg7: memref<1x256xf32, #tpu.memory_space<vmem>>, %arg8: memref<128x128xbf16, #tpu.memory_space<vmem>>, %arg9: memref<1x128xf32, #tpu.memory_space<vmem>>, %arg10: memref<128x128xbf16, #tpu.memory_space<vmem>>, %arg11: memref<1x128xf32, #tpu.memory_space<vmem>>, %arg12: memref<8x8x128xf32, #tpu.memory_space<vmem>>, %arg13: memref<8x8x256xbf16, #tpu.memory_space<vmem>>, %arg14: memref<8x8x128xbf16, #tpu.memory_space<vmem>>) attributes {dimension_semantics = [#tpu.dimension_semantics<parallel>], iteration_bounds = array<i64: 1>, scalar_prefetch = 0 : i64, scratch_operands = 2 : i64, tpu.core_type = #tpu.core_type<tc>, window_params = [{transform_indices = @transform_0, window_bounds = array<i64: 8, 8, 128>}, {pipeline_mode = #tpu.pipeline_mode<synchronous>, transform_indices = @transform_1, window_bounds = array<i64: 128, 128>}, {pipeline_mode = #tpu.pipeline_mode<synchronous>, transform_indices = @transform_2, window_bounds = array<i64: 1, 128>}, {pipeline_mode = #tpu.pipeline_mode<synchronous>, transform_indices = @transform_3, window_bounds = array<i64: 1, 128>}, {pipeline_mode = #tpu.pipeline_mode<synchronous>, transform_indices = @transform_4, window_bounds = array<i64: 1, 128>}, {pipeline_mode = #tpu.pipeline_mode<synchronous>, transform_indices = @transform_5, window_bounds = array<i64: 128, 256>}, {pipeline_mode = #tpu.pipeline_mode<synchronous>, transform_indices = @transform_6, window_bounds = array<i64: 1, 256>}, {pipeline_mode = #tpu.pipeline_mode<synchronous>, transform_indices = @transform_7, window_bounds = array<i64: 128, 128>}, {pipeline_mode = #tpu.pipeline_mode<synchronous>, transform_indices = @transform_8, window_bounds = array<i64: 1, 128>}, {pipeline_mode = #tpu.pipeline_mode<synchronous>, transform_indices = @transform_9, window_bounds = array<i64: 128, 128>}, {pipeline_mode = #tpu.pipeline_mode<synchronous>, transform_indices = @transform_10, window_bounds = array<i64: 1, 128>}, {transform_indices = @transform_11, window_bounds = array<i64: 8, 8, 128>}]} {
    %c0 = arith.constant 0 : index
    %c0_0 = arith.constant 0 : index
    %c0_1 = arith.constant 0 : index
    %0 = vector.load %arg1[%c0, %c0_0, %c0_1] : memref<8x8x128xf32, #tpu.memory_space<vmem>>, vector<8x8x128xf32>
    %1 = vector.shape_cast %0 : vector<8x8x128xf32> to vector<64x128xf32>
    %c0_2 = arith.constant 0 : index
    %c0_3 = arith.constant 0 : index
    %2 = vector.load %arg2[%c0_2, %c0_3] : memref<128x128xf32, #tpu.memory_space<vmem>>, vector<128x128xf32>
    %cst = arith.constant dense<0.000000e+00> : vector<64x128xf32>
    %3 = tpu.matmul %1, %2, %cst {dimension_numbers = #tpu.dot_dimension_numbers<[1], [0], [0], [1], [0, 0, 1, 1], [], []>} : vector<64x128xf32>, vector<128x128xf32>, vector<64x128xf32> -> vector<64x128xf32>
    %c0_4 = arith.constant 0 : index
    %c0_5 = arith.constant 0 : index
    %4 = vector.load %arg3[%c0_4, %c0_5] : memref<1x128xf32, #tpu.memory_space<vmem>>, vector<1x128xf32>
    %5 = vector.broadcast %4 : vector<1x128xf32> to vector<64x128xf32>
    %6 = arith.addf %3, %5 : vector<64x128xf32>
    %7 = vector.shape_cast %6 : vector<64x128xf32> to vector<8x8x128xf32>
    %cst_6 = arith.constant dense<0.000000e+00> : vector<8x128xf32>
    %8 = vector.multi_reduction <add>, %7, %cst_6 [0] : vector<8x8x128xf32> to vector<8x128xf32>
    %9 = vector.shape_cast %8 : vector<8x128xf32> to vector<1x8x128xf32>
    %cst_7 = arith.constant 1.250000e-01 : f32
    %10 = vector.broadcast %cst_7 : f32 to vector<1x8x128xf32>
    %11 = arith.mulf %9, %10 : vector<1x8x128xf32>
    %12 = arith.mulf %7, %7 : vector<8x8x128xf32>
    %cst_8 = arith.constant dense<0.000000e+00> : vector<8x128xf32>
    %13 = vector.multi_reduction <add>, %12, %cst_8 [0] : vector<8x8x128xf32> to vector<8x128xf32>
    %14 = vector.shape_cast %13 : vector<8x128xf32> to vector<1x8x128xf32>
    %cst_9 = arith.constant 1.250000e-01 : f32
    %15 = vector.broadcast %cst_9 : f32 to vector<1x8x128xf32>
    %16 = arith.mulf %14, %15 : vector<1x8x128xf32>
    %17 = arith.mulf %11, %11 : vector<1x8x128xf32>
    %18 = arith.subf %16, %17 : vector<1x8x128xf32>
    %19 = vector.broadcast %11 : vector<1x8x128xf32> to vector<8x8x128xf32>
    %20 = arith.subf %7, %19 : vector<8x8x128xf32>
    %cst_10 = arith.constant 9.99999974E-6 : f32
    %21 = vector.broadcast %cst_10 : f32 to vector<1x8x128xf32>
    %22 = arith.addf %18, %21 : vector<1x8x128xf32>
    %23 = math.rsqrt %22 : vector<1x8x128xf32>
    %24 = vector.broadcast %23 : vector<1x8x128xf32> to vector<8x8x128xf32>
    %25 = arith.mulf %20, %24 : vector<8x8x128xf32>
    %c0_11 = arith.constant 0 : index
    %c0_12 = arith.constant 0 : index
    %26 = vector.load %arg4[%c0_11, %c0_12] : memref<1x128xf32, #tpu.memory_space<vmem>>, vector<1x128xf32>
    %27 = vector.shape_cast %26 : vector<1x128xf32> to vector<1x1x128xf32>
    %28 = vector.broadcast %27 : vector<1x1x128xf32> to vector<8x8x128xf32>
    %29 = arith.mulf %25, %28 : vector<8x8x128xf32>
    %c0_13 = arith.constant 0 : index
    %c0_14 = arith.constant 0 : index
    %30 = vector.load %arg5[%c0_13, %c0_14] : memref<1x128xf32, #tpu.memory_space<vmem>>, vector<1x128xf32>
    %31 = vector.shape_cast %30 : vector<1x128xf32> to vector<1x1x128xf32>
    %32 = vector.broadcast %31 : vector<1x1x128xf32> to vector<8x8x128xf32>
    %33 = arith.addf %29, %32 : vector<8x8x128xf32>
    %cst_15 = arith.constant 0.000000e+00 : f32
    %34 = vector.broadcast %cst_15 : f32 to vector<8x8x128xf32>
    %35 = arith.maximumf %33, %34 : vector<8x8x128xf32>
    %36 = vector.shape_cast %35 : vector<8x8x128xf32> to vector<64x128xf32>
    %37 = arith.truncf %36 : vector<64x128xf32> to vector<64x128xbf16>
    %c0_16 = arith.constant 0 : index
    %c0_17 = arith.constant 0 : index
    %38 = vector.load %arg6[%c0_16, %c0_17] : memref<128x256xbf16, #tpu.memory_space<vmem>>, vector<128x256xbf16>
    %cst_18 = arith.constant dense<0.000000e+00> : vector<64x256xf32>
    %39 = tpu.matmul %37, %38, %cst_18 {dimension_numbers = #tpu.dot_dimension_numbers<[1], [0], [0], [1], [0, 0, 1, 1], [], []>} : vector<64x128xbf16>, vector<128x256xbf16>, vector<64x256xf32> -> vector<64x256xf32>
    %c0_19 = arith.constant 0 : index
    %c0_20 = arith.constant 0 : index
    %40 = vector.load %arg7[%c0_19, %c0_20] : memref<1x256xf32, #tpu.memory_space<vmem>>, vector<1x256xf32>
    %41 = vector.broadcast %40 : vector<1x256xf32> to vector<64x256xf32>
    %42 = arith.addf %39, %41 : vector<64x256xf32>
    %43 = vector.shape_cast %42 : vector<64x256xf32> to vector<8x8x256xf32>
    %44 = arith.truncf %43 : vector<8x8x256xf32> to vector<8x8x256xbf16>
    %c0_21 = arith.constant 0 : index
    %c0_22 = arith.constant 0 : index
    %c0_23 = arith.constant 0 : index
    %45 = vector.load %arg13[%c0_21, %c0_22, %c0_23] : memref<8x8x256xbf16, #tpu.memory_space<vmem>>, vector<8x8x256xbf16>
    tpu.vector_store %arg13[%c0_21, %c0_22, %c0_23], %44 {strides = array<i32>} : memref<8x8x256xbf16, #tpu.memory_space<vmem>>, vector<8x8x256xbf16>,
    %c0_24 = arith.constant 0 : index
    %c0_25 = arith.constant 0 : index
    %46 = vector.load %arg8[%c0_24, %c0_25] : memref<128x128xbf16, #tpu.memory_space<vmem>>, vector<128x128xbf16>
    %cst_26 = arith.constant dense<0.000000e+00> : vector<64x128xf32>
    %47 = tpu.matmul %37, %46, %cst_26 {dimension_numbers = #tpu.dot_dimension_numbers<[1], [0], [0], [1], [0, 0, 1, 1], [], []>} : vector<64x128xbf16>, vector<128x128xbf16>, vector<64x128xf32> -> vector<64x128xf32>
    %c0_27 = arith.constant 0 : index
    %c0_28 = arith.constant 0 : index
    %48 = vector.load %arg9[%c0_27, %c0_28] : memref<1x128xf32, #tpu.memory_space<vmem>>, vector<1x128xf32>
    %49 = vector.broadcast %48 : vector<1x128xf32> to vector<64x128xf32>
    %50 = arith.addf %47, %49 : vector<64x128xf32>
    %51 = vector.shape_cast %50 : vector<64x128xf32> to vector<8x8x128xf32>
    %52 = arith.truncf %51 : vector<8x8x128xf32> to vector<8x8x128xbf16>
    %c0_29 = arith.constant 0 : index
    %c0_30 = arith.constant 0 : index
    %c0_31 = arith.constant 0 : index
    %53 = vector.load %arg14[%c0_29, %c0_30, %c0_31] : memref<8x8x128xbf16, #tpu.memory_space<vmem>>, vector<8x8x128xbf16>
    tpu.vector_store %arg14[%c0_29, %c0_30, %c0_31], %52 {strides = array<i32>} : memref<8x8x128xbf16, #tpu.memory_space<vmem>>, vector<8x8x128xbf16>,
    %c0_32 = arith.constant 0 : index
    %c0_33 = arith.constant 0 : index
    %54 = vector.load %arg6[%c0_32, %c0_33] : memref<128x256xbf16, #tpu.memory_space<vmem>>, vector<128x256xbf16>
    %c0_34 = arith.constant 0 : index
    %c0_35 = arith.constant 0 : index
    %55 = vector.load %arg8[%c0_34, %c0_35] : memref<128x128xbf16, #tpu.memory_space<vmem>>, vector<128x128xbf16>
    %cst_36 = arith.constant 0.000000e+00 : f32
    %56 = vector.broadcast %cst_36 : f32 to vector<8x128xf32>
    %c0_i32 = arith.constant 0 : i32
    %c7_i32 = arith.constant 7 : i32
    %57 = arith.subi %c7_i32, %c0_i32 : i32
    %58 = arith.index_cast %57 : i32 to index
    %c0_37 = arith.constant 0 : index
    %c0_38 = arith.constant 0 : index
    %59 = vector.load %arg13[%58, %c0_37, %c0_38] : memref<8x8x256xbf16, #tpu.memory_space<vmem>>, vector<1x8x256xbf16>
    %60 = vector.shape_cast %59 : vector<1x8x256xbf16> to vector<8x256xbf16>
    %61 = arith.extf %60 : vector<8x256xbf16> to vector<8x256xf32>
    %62 = arith.truncf %56 : vector<8x128xf32> to vector<8x128xbf16>
    %cst_39 = arith.constant dense<0.000000e+00> : vector<8x256xf32>
    %63 = tpu.matmul %62, %54, %cst_39 {dimension_numbers = #tpu.dot_dimension_numbers<[1], [0], [0], [1], [0, 0, 1, 1], [], []>} : vector<8x128xbf16>, vector<128x256xbf16>, vector<8x256xf32> -> vector<8x256xf32>
    %64 = arith.addf %61, %63 : vector<8x256xf32>
    %65 = vector.extract_strided_slice %64 {offsets = [0, 0], sizes = [8, 128], strides = [1, 1]} : vector<8x256xf32> to vector<8x128xf32>
    %66 = arith.negf %65 : vector<8x128xf32>
    %67 = math.exp %66 : vector<8x128xf32>
    %cst_40 = arith.constant 1.000000e+00 : f32
    %68 = vector.broadcast %cst_40 : f32 to vector<8x128xf32>
    %69 = arith.addf %68, %67 : vector<8x128xf32>
    %70 = arith.divf %68, %69 : vector<8x128xf32>
    %71 = vector.extract_strided_slice %64 {offsets = [0, 128], sizes = [8, 128], strides = [1, 1]} : vector<8x256xf32> to vector<8x128xf32>
    %72 = arith.negf %71 : vector<8x128xf32>
    %73 = math.exp %72 : vector<8x128xf32>
    %cst_41 = arith.constant 1.000000e+00 : f32
    %74 = vector.broadcast %cst_41 : f32 to vector<8x128xf32>
    %75 = arith.addf %74, %73 : vector<8x128xf32>
    %76 = arith.divf %74, %75 : vector<8x128xf32>
    %77 = arith.index_cast %57 : i32 to index
    %c0_42 = arith.constant 0 : index
    %c0_43 = arith.constant 0 : index
    %78 = vector.load %arg14[%77, %c0_42, %c0_43] : memref<8x8x128xbf16, #tpu.memory_space<vmem>>, vector<1x8x128xbf16>
    %79 = vector.shape_cast %78 : vector<1x8x128xbf16> to vector<8x128xbf16>
    %80 = arith.extf %79 : vector<8x128xbf16> to vector<8x128xf32>
    %81 = arith.mulf %70, %56 : vector<8x128xf32>
    %82 = arith.truncf %81 : vector<8x128xf32> to vector<8x128xbf16>
    %cst_44 = arith.constant dense<0.000000e+00> : vector<8x128xf32>
    %83 = tpu.matmul %82, %55, %cst_44 {dimension_numbers = #tpu.dot_dimension_numbers<[1], [0], [0], [1], [0, 0, 1, 1], [], []>} : vector<8x128xbf16>, vector<128x128xbf16>, vector<8x128xf32> -> vector<8x128xf32>
    %84 = arith.addf %80, %83 : vector<8x128xf32>
    %85 = math.tanh %84 : vector<8x128xf32>
    %cst_45 = arith.constant 1.000000e+00 : f32
    %86 = vector.broadcast %cst_45 : f32 to vector<8x128xf32>
    %87 = arith.subf %86, %76 : vector<8x128xf32>
    %88 = arith.mulf %87, %56 : vector<8x128xf32>
    %89 = arith.mulf %76, %85 : vector<8x128xf32>
    %90 = arith.addf %88, %89 : vector<8x128xf32>
    %91 = arith.index_cast %57 : i32 to index
    %c0_46 = arith.constant 0 : index
    %c0_47 = arith.constant 0 : index
    %92 = vector.load %arg12[%91, %c0_46, %c0_47] : memref<8x8x128xf32, #tpu.memory_space<vmem>>, vector<1x8x128xf32>
    %93 = vector.shape_cast %92 : vector<1x8x128xf32> to vector<8x128xf32>
    %94 = vector.shape_cast %90 : vector<8x128xf32> to vector<1x8x128xf32>
    tpu.vector_store %arg12[%91, %c0_46, %c0_47], %94 {strides = array<i32>} : memref<8x8x128xf32, #tpu.memory_space<vmem>>, vector<1x8x128xf32>,
    %c1_i32 = arith.constant 1 : i32
    %c7_i32_48 = arith.constant 7 : i32
    %95 = arith.subi %c7_i32_48, %c1_i32 : i32
    %96 = arith.index_cast %95 : i32 to index
    %c0_49 = arith.constant 0 : index
    %c0_50 = arith.constant 0 : index
    %97 = vector.load %arg13[%96, %c0_49, %c0_50] : memref<8x8x256xbf16, #tpu.memory_space<vmem>>, vector<1x8x256xbf16>
    %98 = vector.shape_cast %97 : vector<1x8x256xbf16> to vector<8x256xbf16>
    %99 = arith.extf %98 : vector<8x256xbf16> to vector<8x256xf32>
    %100 = arith.truncf %90 : vector<8x128xf32> to vector<8x128xbf16>
    %cst_51 = arith.constant dense<0.000000e+00> : vector<8x256xf32>
    %101 = tpu.matmul %100, %54, %cst_51 {dimension_numbers = #tpu.dot_dimension_numbers<[1], [0], [0], [1], [0, 0, 1, 1], [], []>} : vector<8x128xbf16>, vector<128x256xbf16>, vector<8x256xf32> -> vector<8x256xf32>
    %102 = arith.addf %99, %101 : vector<8x256xf32>
    %103 = vector.extract_strided_slice %102 {offsets = [0, 0], sizes = [8, 128], strides = [1, 1]} : vector<8x256xf32> to vector<8x128xf32>
    %104 = arith.negf %103 : vector<8x128xf32>
    %105 = math.exp %104 : vector<8x128xf32>
    %cst_52 = arith.constant 1.000000e+00 : f32
    %106 = vector.broadcast %cst_52 : f32 to vector<8x128xf32>
    %107 = arith.addf %106, %105 : vector<8x128xf32>
    %108 = arith.divf %106, %107 : vector<8x128xf32>
    %109 = vector.extract_strided_slice %102 {offsets = [0, 128], sizes = [8, 128], strides = [1, 1]} : vector<8x256xf32> to vector<8x128xf32>
    %110 = arith.negf %109 : vector<8x128xf32>
    %111 = math.exp %110 : vector<8x128xf32>
    %cst_53 = arith.constant 1.000000e+00 : f32
    %112 = vector.broadcast %cst_53 : f32 to vector<8x128xf32>
    %113 = arith.addf %112, %111 : vector<8x128xf32>
    %114 = arith.divf %112, %113 : vector<8x128xf32>
    %115 = arith.index_cast %95 : i32 to index
    %c0_54 = arith.constant 0 : index
    %c0_55 = arith.constant 0 : index
    %116 = vector.load %arg14[%115, %c0_54, %c0_55] : memref<8x8x128xbf16, #tpu.memory_space<vmem>>, vector<1x8x128xbf16>
    %117 = vector.shape_cast %116 : vector<1x8x128xbf16> to vector<8x128xbf16>
    %118 = arith.extf %117 : vector<8x128xbf16> to vector<8x128xf32>
    %119 = arith.mulf %108, %90 : vector<8x128xf32>
    %120 = arith.truncf %119 : vector<8x128xf32> to vector<8x128xbf16>
    %cst_56 = arith.constant dense<0.000000e+00> : vector<8x128xf32>
    %121 = tpu.matmul %120, %55, %cst_56 {dimension_numbers = #tpu.dot_dimension_numbers<[1], [0], [0], [1], [0, 0, 1, 1], [], []>} : vector<8x128xbf16>, vector<128x128xbf16>, vector<8x128xf32> -> vector<8x128xf32>
    %122 = arith.addf %118, %121 : vector<8x128xf32>
    %123 = math.tanh %122 : vector<8x128xf32>
    %cst_57 = arith.constant 1.000000e+00 : f32
    %124 = vector.broadcast %cst_57 : f32 to vector<8x128xf32>
    %125 = arith.subf %124, %114 : vector<8x128xf32>
    %126 = arith.mulf %125, %90 : vector<8x128xf32>
    %127 = arith.mulf %114, %123 : vector<8x128xf32>
    %128 = arith.addf %126, %127 : vector<8x128xf32>
    %129 = arith.index_cast %95 : i32 to index
    %c0_58 = arith.constant 0 : index
    %c0_59 = arith.constant 0 : index
    %130 = vector.load %arg12[%129, %c0_58, %c0_59] : memref<8x8x128xf32, #tpu.memory_space<vmem>>, vector<1x8x128xf32>
    %131 = vector.shape_cast %130 : vector<1x8x128xf32> to vector<8x128xf32>
    %132 = vector.shape_cast %128 : vector<8x128xf32> to vector<1x8x128xf32>
    tpu.vector_store %arg12[%129, %c0_58, %c0_59], %132 {strides = array<i32>} : memref<8x8x128xf32, #tpu.memory_space<vmem>>, vector<1x8x128xf32>,
    %c2_i32 = arith.constant 2 : i32
    %c7_i32_60 = arith.constant 7 : i32
    %133 = arith.subi %c7_i32_60, %c2_i32 : i32
    %134 = arith.index_cast %133 : i32 to index
    %c0_61 = arith.constant 0 : index
    %c0_62 = arith.constant 0 : index
    %135 = vector.load %arg13[%134, %c0_61, %c0_62] : memref<8x8x256xbf16, #tpu.memory_space<vmem>>, vector<1x8x256xbf16>
    %136 = vector.shape_cast %135 : vector<1x8x256xbf16> to vector<8x256xbf16>
    %137 = arith.extf %136 : vector<8x256xbf16> to vector<8x256xf32>
    %138 = arith.truncf %128 : vector<8x128xf32> to vector<8x128xbf16>
    %cst_63 = arith.constant dense<0.000000e+00> : vector<8x256xf32>
    %139 = tpu.matmul %138, %54, %cst_63 {dimension_numbers = #tpu.dot_dimension_numbers<[1], [0], [0], [1], [0, 0, 1, 1], [], []>} : vector<8x128xbf16>, vector<128x256xbf16>, vector<8x256xf32> -> vector<8x256xf32>
    %140 = arith.addf %137, %139 : vector<8x256xf32>
    %141 = vector.extract_strided_slice %140 {offsets = [0, 0], sizes = [8, 128], strides = [1, 1]} : vector<8x256xf32> to vector<8x128xf32>
    %142 = arith.negf %141 : vector<8x128xf32>
    %143 = math.exp %142 : vector<8x128xf32>
    %cst_64 = arith.constant 1.000000e+00 : f32
    %144 = vector.broadcast %cst_64 : f32 to vector<8x128xf32>
    %145 = arith.addf %144, %143 : vector<8x128xf32>
    %146 = arith.divf %144, %145 : vector<8x128xf32>
    %147 = vector.extract_strided_slice %140 {offsets = [0, 128], sizes = [8, 128], strides = [1, 1]} : vector<8x256xf32> to vector<8x128xf32>
    %148 = arith.negf %147 : vector<8x128xf32>
    %149 = math.exp %148 : vector<8x128xf32>
    %cst_65 = arith.constant 1.000000e+00 : f32
    %150 = vector.broadcast %cst_65 : f32 to vector<8x128xf32>
    %151 = arith.addf %150, %149 : vector<8x128xf32>
    %152 = arith.divf %150, %151 : vector<8x128xf32>
    %153 = arith.index_cast %133 : i32 to index
    %c0_66 = arith.constant 0 : index
    %c0_67 = arith.constant 0 : index
    %154 = vector.load %arg14[%153, %c0_66, %c0_67] : memref<8x8x128xbf16, #tpu.memory_space<vmem>>, vector<1x8x128xbf16>
    %155 = vector.shape_cast %154 : vector<1x8x128xbf16> to vector<8x128xbf16>
    %156 = arith.extf %155 : vector<8x128xbf16> to vector<8x128xf32>
    %157 = arith.mulf %146, %128 : vector<8x128xf32>
    %158 = arith.truncf %157 : vector<8x128xf32> to vector<8x128xbf16>
    %cst_68 = arith.constant dense<0.000000e+00> : vector<8x128xf32>
    %159 = tpu.matmul %158, %55, %cst_68 {dimension_numbers = #tpu.dot_dimension_numbers<[1], [0], [0], [1], [0, 0, 1, 1], [], []>} : vector<8x128xbf16>, vector<128x128xbf16>, vector<8x128xf32> -> vector<8x128xf32>
    %160 = arith.addf %156, %159 : vector<8x128xf32>
    %161 = math.tanh %160 : vector<8x128xf32>
    %cst_69 = arith.constant 1.000000e+00 : f32
    %162 = vector.broadcast %cst_69 : f32 to vector<8x128xf32>
    %163 = arith.subf %162, %152 : vector<8x128xf32>
    %164 = arith.mulf %163, %128 : vector<8x128xf32>
    %165 = arith.mulf %152, %161 : vector<8x128xf32>
    %166 = arith.addf %164, %165 : vector<8x128xf32>
    %167 = arith.index_cast %133 : i32 to index
    %c0_70 = arith.constant 0 : index
    %c0_71 = arith.constant 0 : index
    %168 = vector.load %arg12[%167, %c0_70, %c0_71] : memref<8x8x128xf32, #tpu.memory_space<vmem>>, vector<1x8x128xf32>
    %169 = vector.shape_cast %168 : vector<1x8x128xf32> to vector<8x128xf32>
    %170 = vector.shape_cast %166 : vector<8x128xf32> to vector<1x8x128xf32>
    tpu.vector_store %arg12[%167, %c0_70, %c0_71], %170 {strides = array<i32>} : memref<8x8x128xf32, #tpu.memory_space<vmem>>, vector<1x8x128xf32>,
    %c3_i32 = arith.constant 3 : i32
    %c7_i32_72 = arith.constant 7 : i32
    %171 = arith.subi %c7_i32_72, %c3_i32 : i32
    %172 = arith.index_cast %171 : i32 to index
    %c0_73 = arith.constant 0 : index
    %c0_74 = arith.constant 0 : index
    %173 = vector.load %arg13[%172, %c0_73, %c0_74] : memref<8x8x256xbf16, #tpu.memory_space<vmem>>, vector<1x8x256xbf16>
    %174 = vector.shape_cast %173 : vector<1x8x256xbf16> to vector<8x256xbf16>
    %175 = arith.extf %174 : vector<8x256xbf16> to vector<8x256xf32>
    %176 = arith.truncf %166 : vector<8x128xf32> to vector<8x128xbf16>
    %cst_75 = arith.constant dense<0.000000e+00> : vector<8x256xf32>
    %177 = tpu.matmul %176, %54, %cst_75 {dimension_numbers = #tpu.dot_dimension_numbers<[1], [0], [0], [1], [0, 0, 1, 1], [], []>} : vector<8x128xbf16>, vector<128x256xbf16>, vector<8x256xf32> -> vector<8x256xf32>
    %178 = arith.addf %175, %177 : vector<8x256xf32>
    %179 = vector.extract_strided_slice %178 {offsets = [0, 0], sizes = [8, 128], strides = [1, 1]} : vector<8x256xf32> to vector<8x128xf32>
    %180 = arith.negf %179 : vector<8x128xf32>
    %181 = math.exp %180 : vector<8x128xf32>
    %cst_76 = arith.constant 1.000000e+00 : f32
    %182 = vector.broadcast %cst_76 : f32 to vector<8x128xf32>
    %183 = arith.addf %182, %181 : vector<8x128xf32>
    %184 = arith.divf %182, %183 : vector<8x128xf32>
    %185 = vector.extract_strided_slice %178 {offsets = [0, 128], sizes = [8, 128], strides = [1, 1]} : vector<8x256xf32> to vector<8x128xf32>
    %186 = arith.negf %185 : vector<8x128xf32>
    %187 = math.exp %186 : vector<8x128xf32>
    %cst_77 = arith.constant 1.000000e+00 : f32
    %188 = vector.broadcast %cst_77 : f32 to vector<8x128xf32>
    %189 = arith.addf %188, %187 : vector<8x128xf32>
    %190 = arith.divf %188, %189 : vector<8x128xf32>
    %191 = arith.index_cast %171 : i32 to index
    %c0_78 = arith.constant 0 : index
    %c0_79 = arith.constant 0 : index
    %192 = vector.load %arg14[%191, %c0_78, %c0_79] : memref<8x8x128xbf16, #tpu.memory_space<vmem>>, vector<1x8x128xbf16>
    %193 = vector.shape_cast %192 : vector<1x8x128xbf16> to vector<8x128xbf16>
    %194 = arith.extf %193 : vector<8x128xbf16> to vector<8x128xf32>
    %195 = arith.mulf %184, %166 : vector<8x128xf32>
    %196 = arith.truncf %195 : vector<8x128xf32> to vector<8x128xbf16>
    %cst_80 = arith.constant dense<0.000000e+00> : vector<8x128xf32>
    %197 = tpu.matmul %196, %55, %cst_80 {dimension_numbers = #tpu.dot_dimension_numbers<[1], [0], [0], [1], [0, 0, 1, 1], [], []>} : vector<8x128xbf16>, vector<128x128xbf16>, vector<8x128xf32> -> vector<8x128xf32>
    %198 = arith.addf %194, %197 : vector<8x128xf32>
    %199 = math.tanh %198 : vector<8x128xf32>
    %cst_81 = arith.constant 1.000000e+00 : f32
    %200 = vector.broadcast %cst_81 : f32 to vector<8x128xf32>
    %201 = arith.subf %200, %190 : vector<8x128xf32>
    %202 = arith.mulf %201, %166 : vector<8x128xf32>
    %203 = arith.mulf %190, %199 : vector<8x128xf32>
    %204 = arith.addf %202, %203 : vector<8x128xf32>
    %205 = arith.index_cast %171 : i32 to index
    %c0_82 = arith.constant 0 : index
    %c0_83 = arith.constant 0 : index
    %206 = vector.load %arg12[%205, %c0_82, %c0_83] : memref<8x8x128xf32, #tpu.memory_space<vmem>>, vector<1x8x128xf32>
    %207 = vector.shape_cast %206 : vector<1x8x128xf32> to vector<8x128xf32>
    %208 = vector.shape_cast %204 : vector<8x128xf32> to vector<1x8x128xf32>
    tpu.vector_store %arg12[%205, %c0_82, %c0_83], %208 {strides = array<i32>} : memref<8x8x128xf32, #tpu.memory_space<vmem>>, vector<1x8x128xf32>,
    %c4_i32 = arith.constant 4 : i32
    %c7_i32_84 = arith.constant 7 : i32
    %209 = arith.subi %c7_i32_84, %c4_i32 : i32
    %210 = arith.index_cast %209 : i32 to index
    %c0_85 = arith.constant 0 : index
    %c0_86 = arith.constant 0 : index
    %211 = vector.load %arg13[%210, %c0_85, %c0_86] : memref<8x8x256xbf16, #tpu.memory_space<vmem>>, vector<1x8x256xbf16>
    %212 = vector.shape_cast %211 : vector<1x8x256xbf16> to vector<8x256xbf16>
    %213 = arith.extf %212 : vector<8x256xbf16> to vector<8x256xf32>
    %214 = arith.truncf %204 : vector<8x128xf32> to vector<8x128xbf16>
    %cst_87 = arith.constant dense<0.000000e+00> : vector<8x256xf32>
    %215 = tpu.matmul %214, %54, %cst_87 {dimension_numbers = #tpu.dot_dimension_numbers<[1], [0], [0], [1], [0, 0, 1, 1], [], []>} : vector<8x128xbf16>, vector<128x256xbf16>, vector<8x256xf32> -> vector<8x256xf32>
    %216 = arith.addf %213, %215 : vector<8x256xf32>
    %217 = vector.extract_strided_slice %216 {offsets = [0, 0], sizes = [8, 128], strides = [1, 1]} : vector<8x256xf32> to vector<8x128xf32>
    %218 = arith.negf %217 : vector<8x128xf32>
    %219 = math.exp %218 : vector<8x128xf32>
    %cst_88 = arith.constant 1.000000e+00 : f32
    %220 = vector.broadcast %cst_88 : f32 to vector<8x128xf32>
    %221 = arith.addf %220, %219 : vector<8x128xf32>
    %222 = arith.divf %220, %221 : vector<8x128xf32>
    %223 = vector.extract_strided_slice %216 {offsets = [0, 128], sizes = [8, 128], strides = [1, 1]} : vector<8x256xf32> to vector<8x128xf32>
    %224 = arith.negf %223 : vector<8x128xf32>
    %225 = math.exp %224 : vector<8x128xf32>
    %cst_89 = arith.constant 1.000000e+00 : f32
    %226 = vector.broadcast %cst_89 : f32 to vector<8x128xf32>
    %227 = arith.addf %226, %225 : vector<8x128xf32>
    %228 = arith.divf %226, %227 : vector<8x128xf32>
    %229 = arith.index_cast %209 : i32 to index
    %c0_90 = arith.constant 0 : index
    %c0_91 = arith.constant 0 : index
    %230 = vector.load %arg14[%229, %c0_90, %c0_91] : memref<8x8x128xbf16, #tpu.memory_space<vmem>>, vector<1x8x128xbf16>
    %231 = vector.shape_cast %230 : vector<1x8x128xbf16> to vector<8x128xbf16>
    %232 = arith.extf %231 : vector<8x128xbf16> to vector<8x128xf32>
    %233 = arith.mulf %222, %204 : vector<8x128xf32>
    %234 = arith.truncf %233 : vector<8x128xf32> to vector<8x128xbf16>
    %cst_92 = arith.constant dense<0.000000e+00> : vector<8x128xf32>
    %235 = tpu.matmul %234, %55, %cst_92 {dimension_numbers = #tpu.dot_dimension_numbers<[1], [0], [0], [1], [0, 0, 1, 1], [], []>} : vector<8x128xbf16>, vector<128x128xbf16>, vector<8x128xf32> -> vector<8x128xf32>
    %236 = arith.addf %232, %235 : vector<8x128xf32>
    %237 = math.tanh %236 : vector<8x128xf32>
    %cst_93 = arith.constant 1.000000e+00 : f32
    %238 = vector.broadcast %cst_93 : f32 to vector<8x128xf32>
    %239 = arith.subf %238, %228 : vector<8x128xf32>
    %240 = arith.mulf %239, %204 : vector<8x128xf32>
    %241 = arith.mulf %228, %237 : vector<8x128xf32>
    %242 = arith.addf %240, %241 : vector<8x128xf32>
    %243 = arith.index_cast %209 : i32 to index
    %c0_94 = arith.constant 0 : index
    %c0_95 = arith.constant 0 : index
    %244 = vector.load %arg12[%243, %c0_94, %c0_95] : memref<8x8x128xf32, #tpu.memory_space<vmem>>, vector<1x8x128xf32>
    %245 = vector.shape_cast %244 : vector<1x8x128xf32> to vector<8x128xf32>
    %246 = vector.shape_cast %242 : vector<8x128xf32> to vector<1x8x128xf32>
    tpu.vector_store %arg12[%243, %c0_94, %c0_95], %246 {strides = array<i32>} : memref<8x8x128xf32, #tpu.memory_space<vmem>>, vector<1x8x128xf32>,
    %c5_i32 = arith.constant 5 : i32
    %c7_i32_96 = arith.constant 7 : i32
    %247 = arith.subi %c7_i32_96, %c5_i32 : i32
    %248 = arith.index_cast %247 : i32 to index
    %c0_97 = arith.constant 0 : index
    %c0_98 = arith.constant 0 : index
    %249 = vector.load %arg13[%248, %c0_97, %c0_98] : memref<8x8x256xbf16, #tpu.memory_space<vmem>>, vector<1x8x256xbf16>
    %250 = vector.shape_cast %249 : vector<1x8x256xbf16> to vector<8x256xbf16>
    %251 = arith.extf %250 : vector<8x256xbf16> to vector<8x256xf32>
    %252 = arith.truncf %242 : vector<8x128xf32> to vector<8x128xbf16>
    %cst_99 = arith.constant dense<0.000000e+00> : vector<8x256xf32>
    %253 = tpu.matmul %252, %54, %cst_99 {dimension_numbers = #tpu.dot_dimension_numbers<[1], [0], [0], [1], [0, 0, 1, 1], [], []>} : vector<8x128xbf16>, vector<128x256xbf16>, vector<8x256xf32> -> vector<8x256xf32>
    %254 = arith.addf %251, %253 : vector<8x256xf32>
    %255 = vector.extract_strided_slice %254 {offsets = [0, 0], sizes = [8, 128], strides = [1, 1]} : vector<8x256xf32> to vector<8x128xf32>
    %256 = arith.negf %255 : vector<8x128xf32>
    %257 = math.exp %256 : vector<8x128xf32>
    %cst_100 = arith.constant 1.000000e+00 : f32
    %258 = vector.broadcast %cst_100 : f32 to vector<8x128xf32>
    %259 = arith.addf %258, %257 : vector<8x128xf32>
    %260 = arith.divf %258, %259 : vector<8x128xf32>
    %261 = vector.extract_strided_slice %254 {offsets = [0, 128], sizes = [8, 128], strides = [1, 1]} : vector<8x256xf32> to vector<8x128xf32>
    %262 = arith.negf %261 : vector<8x128xf32>
    %263 = math.exp %262 : vector<8x128xf32>
    %cst_101 = arith.constant 1.000000e+00 : f32
    %264 = vector.broadcast %cst_101 : f32 to vector<8x128xf32>
    %265 = arith.addf %264, %263 : vector<8x128xf32>
    %266 = arith.divf %264, %265 : vector<8x128xf32>
    %267 = arith.index_cast %247 : i32 to index
    %c0_102 = arith.constant 0 : index
    %c0_103 = arith.constant 0 : index
    %268 = vector.load %arg14[%267, %c0_102, %c0_103] : memref<8x8x128xbf16, #tpu.memory_space<vmem>>, vector<1x8x128xbf16>
    %269 = vector.shape_cast %268 : vector<1x8x128xbf16> to vector<8x128xbf16>
    %270 = arith.extf %269 : vector<8x128xbf16> to vector<8x128xf32>
    %271 = arith.mulf %260, %242 : vector<8x128xf32>
    %272 = arith.truncf %271 : vector<8x128xf32> to vector<8x128xbf16>
    %cst_104 = arith.constant dense<0.000000e+00> : vector<8x128xf32>
    %273 = tpu.matmul %272, %55, %cst_104 {dimension_numbers = #tpu.dot_dimension_numbers<[1], [0], [0], [1], [0, 0, 1, 1], [], []>} : vector<8x128xbf16>, vector<128x128xbf16>, vector<8x128xf32> -> vector<8x128xf32>
    %274 = arith.addf %270, %273 : vector<8x128xf32>
    %275 = math.tanh %274 : vector<8x128xf32>
    %cst_105 = arith.constant 1.000000e+00 : f32
    %276 = vector.broadcast %cst_105 : f32 to vector<8x128xf32>
    %277 = arith.subf %276, %266 : vector<8x128xf32>
    %278 = arith.mulf %277, %242 : vector<8x128xf32>
    %279 = arith.mulf %266, %275 : vector<8x128xf32>
    %280 = arith.addf %278, %279 : vector<8x128xf32>
    %281 = arith.index_cast %247 : i32 to index
    %c0_106 = arith.constant 0 : index
    %c0_107 = arith.constant 0 : index
    %282 = vector.load %arg12[%281, %c0_106, %c0_107] : memref<8x8x128xf32, #tpu.memory_space<vmem>>, vector<1x8x128xf32>
    %283 = vector.shape_cast %282 : vector<1x8x128xf32> to vector<8x128xf32>
    %284 = vector.shape_cast %280 : vector<8x128xf32> to vector<1x8x128xf32>
    tpu.vector_store %arg12[%281, %c0_106, %c0_107], %284 {strides = array<i32>} : memref<8x8x128xf32, #tpu.memory_space<vmem>>, vector<1x8x128xf32>,
    %c6_i32 = arith.constant 6 : i32
    %c7_i32_108 = arith.constant 7 : i32
    %285 = arith.subi %c7_i32_108, %c6_i32 : i32
    %286 = arith.index_cast %285 : i32 to index
    %c0_109 = arith.constant 0 : index
    %c0_110 = arith.constant 0 : index
    %287 = vector.load %arg13[%286, %c0_109, %c0_110] : memref<8x8x256xbf16, #tpu.memory_space<vmem>>, vector<1x8x256xbf16>
    %288 = vector.shape_cast %287 : vector<1x8x256xbf16> to vector<8x256xbf16>
    %289 = arith.extf %288 : vector<8x256xbf16> to vector<8x256xf32>
    %290 = arith.truncf %280 : vector<8x128xf32> to vector<8x128xbf16>
    %cst_111 = arith.constant dense<0.000000e+00> : vector<8x256xf32>
    %291 = tpu.matmul %290, %54, %cst_111 {dimension_numbers = #tpu.dot_dimension_numbers<[1], [0], [0], [1], [0, 0, 1, 1], [], []>} : vector<8x128xbf16>, vector<128x256xbf16>, vector<8x256xf32> -> vector<8x256xf32>
    %292 = arith.addf %289, %291 : vector<8x256xf32>
    %293 = vector.extract_strided_slice %292 {offsets = [0, 0], sizes = [8, 128], strides = [1, 1]} : vector<8x256xf32> to vector<8x128xf32>
    %294 = arith.negf %293 : vector<8x128xf32>
    %295 = math.exp %294 : vector<8x128xf32>
    %cst_112 = arith.constant 1.000000e+00 : f32
    %296 = vector.broadcast %cst_112 : f32 to vector<8x128xf32>
    %297 = arith.addf %296, %295 : vector<8x128xf32>
    %298 = arith.divf %296, %297 : vector<8x128xf32>
    %299 = vector.extract_strided_slice %292 {offsets = [0, 128], sizes = [8, 128], strides = [1, 1]} : vector<8x256xf32> to vector<8x128xf32>
    %300 = arith.negf %299 : vector<8x128xf32>
    %301 = math.exp %300 : vector<8x128xf32>
    %cst_113 = arith.constant 1.000000e+00 : f32
    %302 = vector.broadcast %cst_113 : f32 to vector<8x128xf32>
    %303 = arith.addf %302, %301 : vector<8x128xf32>
    %304 = arith.divf %302, %303 : vector<8x128xf32>
    %305 = arith.index_cast %285 : i32 to index
    %c0_114 = arith.constant 0 : index
    %c0_115 = arith.constant 0 : index
    %306 = vector.load %arg14[%305, %c0_114, %c0_115] : memref<8x8x128xbf16, #tpu.memory_space<vmem>>, vector<1x8x128xbf16>
    %307 = vector.shape_cast %306 : vector<1x8x128xbf16> to vector<8x128xbf16>
    %308 = arith.extf %307 : vector<8x128xbf16> to vector<8x128xf32>
    %309 = arith.mulf %298, %280 : vector<8x128xf32>
    %310 = arith.truncf %309 : vector<8x128xf32> to vector<8x128xbf16>
    %cst_116 = arith.constant dense<0.000000e+00> : vector<8x128xf32>
    %311 = tpu.matmul %310, %55, %cst_116 {dimension_numbers = #tpu.dot_dimension_numbers<[1], [0], [0], [1], [0, 0, 1, 1], [], []>} : vector<8x128xbf16>, vector<128x128xbf16>, vector<8x128xf32> -> vector<8x128xf32>
    %312 = arith.addf %308, %311 : vector<8x128xf32>
    %313 = math.tanh %312 : vector<8x128xf32>
    %cst_117 = arith.constant 1.000000e+00 : f32
    %314 = vector.broadcast %cst_117 : f32 to vector<8x128xf32>
    %315 = arith.subf %314, %304 : vector<8x128xf32>
    %316 = arith.mulf %315, %280 : vector<8x128xf32>
    %317 = arith.mulf %304, %313 : vector<8x128xf32>
    %318 = arith.addf %316, %317 : vector<8x128xf32>
    %319 = arith.index_cast %285 : i32 to index
    %c0_118 = arith.constant 0 : index
    %c0_119 = arith.constant 0 : index
    %320 = vector.load %arg12[%319, %c0_118, %c0_119] : memref<8x8x128xf32, #tpu.memory_space<vmem>>, vector<1x8x128xf32>
    %321 = vector.shape_cast %320 : vector<1x8x128xf32> to vector<8x128xf32>
    %322 = vector.shape_cast %318 : vector<8x128xf32> to vector<1x8x128xf32>
    tpu.vector_store %arg12[%319, %c0_118, %c0_119], %322 {strides = array<i32>} : memref<8x8x128xf32, #tpu.memory_space<vmem>>, vector<1x8x128xf32>,
    %c7_i32_120 = arith.constant 7 : i32
    %c7_i32_121 = arith.constant 7 : i32
    %323 = arith.subi %c7_i32_121, %c7_i32_120 : i32
    %324 = arith.index_cast %323 : i32 to index
    %c0_122 = arith.constant 0 : index
    %c0_123 = arith.constant 0 : index
    %325 = vector.load %arg13[%324, %c0_122, %c0_123] : memref<8x8x256xbf16, #tpu.memory_space<vmem>>, vector<1x8x256xbf16>
    %326 = vector.shape_cast %325 : vector<1x8x256xbf16> to vector<8x256xbf16>
    %327 = arith.extf %326 : vector<8x256xbf16> to vector<8x256xf32>
    %328 = arith.truncf %318 : vector<8x128xf32> to vector<8x128xbf16>
    %cst_124 = arith.constant dense<0.000000e+00> : vector<8x256xf32>
    %329 = tpu.matmul %328, %54, %cst_124 {dimension_numbers = #tpu.dot_dimension_numbers<[1], [0], [0], [1], [0, 0, 1, 1], [], []>} : vector<8x128xbf16>, vector<128x256xbf16>, vector<8x256xf32> -> vector<8x256xf32>
    %330 = arith.addf %327, %329 : vector<8x256xf32>
    %331 = vector.extract_strided_slice %330 {offsets = [0, 0], sizes = [8, 128], strides = [1, 1]} : vector<8x256xf32> to vector<8x128xf32>
    %332 = arith.negf %331 : vector<8x128xf32>
    %333 = math.exp %332 : vector<8x128xf32>
    %cst_125 = arith.constant 1.000000e+00 : f32
    %334 = vector.broadcast %cst_125 : f32 to vector<8x128xf32>
    %335 = arith.addf %334, %333 : vector<8x128xf32>
    %336 = arith.divf %334, %335 : vector<8x128xf32>
    %337 = vector.extract_strided_slice %330 {offsets = [0, 128], sizes = [8, 128], strides = [1, 1]} : vector<8x256xf32> to vector<8x128xf32>
    %338 = arith.negf %337 : vector<8x128xf32>
    %339 = math.exp %338 : vector<8x128xf32>
    %cst_126 = arith.constant 1.000000e+00 : f32
    %340 = vector.broadcast %cst_126 : f32 to vector<8x128xf32>
    %341 = arith.addf %340, %339 : vector<8x128xf32>
    %342 = arith.divf %340, %341 : vector<8x128xf32>
    %343 = arith.index_cast %323 : i32 to index
    %c0_127 = arith.constant 0 : index
    %c0_128 = arith.constant 0 : index
    %344 = vector.load %arg14[%343, %c0_127, %c0_128] : memref<8x8x128xbf16, #tpu.memory_space<vmem>>, vector<1x8x128xbf16>
    %345 = vector.shape_cast %344 : vector<1x8x128xbf16> to vector<8x128xbf16>
    %346 = arith.extf %345 : vector<8x128xbf16> to vector<8x128xf32>
    %347 = arith.mulf %336, %318 : vector<8x128xf32>
    %348 = arith.truncf %347 : vector<8x128xf32> to vector<8x128xbf16>
    %cst_129 = arith.constant dense<0.000000e+00> : vector<8x128xf32>
    %349 = tpu.matmul %348, %55, %cst_129 {dimension_numbers = #tpu.dot_dimension_numbers<[1], [0], [0], [1], [0, 0, 1, 1], [], []>} : vector<8x128xbf16>, vector<128x128xbf16>, vector<8x128xf32> -> vector<8x128xf32>
    %350 = arith.addf %346, %349 : vector<8x128xf32>
    %351 = math.tanh %350 : vector<8x128xf32>
    %cst_130 = arith.constant 1.000000e+00 : f32
    %352 = vector.broadcast %cst_130 : f32 to vector<8x128xf32>
    %353 = arith.subf %352, %342 : vector<8x128xf32>
    %354 = arith.mulf %353, %318 : vector<8x128xf32>
    %355 = arith.mulf %342, %351 : vector<8x128xf32>
    %356 = arith.addf %354, %355 : vector<8x128xf32>
    %357 = arith.index_cast %323 : i32 to index
    %c0_131 = arith.constant 0 : index
    %c0_132 = arith.constant 0 : index
    %358 = vector.load %arg12[%357, %c0_131, %c0_132] : memref<8x8x128xf32, #tpu.memory_space<vmem>>, vector<1x8x128xf32>
    %359 = vector.shape_cast %358 : vector<1x8x128xf32> to vector<8x128xf32>
    %360 = vector.shape_cast %356 : vector<8x128xf32> to vector<1x8x128xf32>
    tpu.vector_store %arg12[%357, %c0_131, %c0_132], %360 {strides = array<i32>} : memref<8x8x128xf32, #tpu.memory_space<vmem>>, vector<1x8x128xf32>,
    %c8_i32 = arith.constant 8 : i32
    %c0_133 = arith.constant 0 : index
    %c0_134 = arith.constant 0 : index
    %c0_135 = arith.constant 0 : index
    %361 = vector.load %arg12[%c0_133, %c0_134, %c0_135] : memref<8x8x128xf32, #tpu.memory_space<vmem>>, vector<8x8x128xf32>
    %362 = vector.shape_cast %361 : vector<8x8x128xf32> to vector<64x128xf32>
    %363 = arith.truncf %362 : vector<64x128xf32> to vector<64x128xbf16>
    %c0_136 = arith.constant 0 : index
    %c0_137 = arith.constant 0 : index
    %364 = vector.load %arg10[%c0_136, %c0_137] : memref<128x128xbf16, #tpu.memory_space<vmem>>, vector<128x128xbf16>
    %cst_138 = arith.constant dense<0.000000e+00> : vector<64x128xf32>
    %365 = tpu.matmul %363, %364, %cst_138 {dimension_numbers = #tpu.dot_dimension_numbers<[1], [0], [0], [1], [0, 0, 1, 1], [], []>} : vector<64x128xbf16>, vector<128x128xbf16>, vector<64x128xf32> -> vector<64x128xf32>
    %c0_139 = arith.constant 0 : index
    %c0_140 = arith.constant 0 : index
    %366 = vector.load %arg11[%c0_139, %c0_140] : memref<1x128xf32, #tpu.memory_space<vmem>>, vector<1x128xf32>
    %367 = vector.broadcast %366 : vector<1x128xf32> to vector<64x128xf32>
    %368 = arith.addf %365, %367 : vector<64x128xf32>
    %369 = vector.shape_cast %368 : vector<64x128xf32> to vector<8x8x128xf32>
    %c0_141 = arith.constant 0 : index
    %c0_142 = arith.constant 0 : index
    %c0_143 = arith.constant 0 : index
    %370 = vector.load %arg12[%c0_141, %c0_142, %c0_143] : memref<8x8x128xf32, #tpu.memory_space<vmem>>, vector<8x8x128xf32>
    tpu.vector_store %arg12[%c0_141, %c0_142, %c0_143], %369 {strides = array<i32>} : memref<8x8x128xf32, #tpu.memory_space<vmem>>, vector<8x8x128xf32>,
    return
  }
  func.func @transform_0(%arg0: i32) -> (i32, i32, i32) {
    %c0_i32 = arith.constant 0 : i32
    %c0_i32_0 = arith.constant 0 : i32
    %c0_i32_1 = arith.constant 0 : i32
    return %c0_i32, %arg0, %c0_i32_0 : i32, i32, i32
  }
  func.func @transform_1(%arg0: i32) -> (i32, i32) {
    %c0_i32 = arith.constant 0 : i32
    %c0_i32_0 = arith.constant 0 : i32
    %c0_i32_1 = arith.constant 0 : i32
    return %c0_i32, %c0_i32_0 : i32, i32
  }
  func.func @transform_2(%arg0: i32) -> (i32, i32) {
    %c0_i32 = arith.constant 0 : i32
    %c0_i32_0 = arith.constant 0 : i32
    %c0_i32_1 = arith.constant 0 : i32
    return %c0_i32, %c0_i32_0 : i32, i32
  }
  func.func @transform_3(%arg0: i32) -> (i32, i32) {
    %c0_i32 = arith.constant 0 : i32
    %c0_i32_0 = arith.constant 0 : i32
    %c0_i32_1 = arith.constant 0 : i32
    return %c0_i32, %c0_i32_0 : i32, i32
  }
  func.func @transform_4(%arg0: i32) -> (i32, i32) {
    %c0_i32 = arith.constant 0 : i32
    %c0_i32_0 = arith.constant 0 : i32
    %c0_i32_1 = arith.constant 0 : i32
    return %c0_i32, %c0_i32_0 : i32, i32
  }
  func.func @transform_5(%arg0: i32) -> (i32, i32) {
    %c0_i32 = arith.constant 0 : i32
    %c0_i32_0 = arith.constant 0 : i32
    %c0_i32_1 = arith.constant 0 : i32
    return %c0_i32, %c0_i32_0 : i32, i32
  }
  func.func @transform_6(%arg0: i32) -> (i32, i32) {
    %c0_i32 = arith.constant 0 : i32
    %c0_i32_0 = arith.constant 0 : i32
    %c0_i32_1 = arith.constant 0 : i32
    return %c0_i32, %c0_i32_0 : i32, i32
  }
  func.func @transform_7(%arg0: i32) -> (i32, i32) {
    %c0_i32 = arith.constant 0 : i32
    %c0_i32_0 = arith.constant 0 : i32
    %c0_i32_1 = arith.constant 0 : i32
    return %c0_i32, %c0_i32_0 : i32, i32
  }
  func.func @transform_8(%arg0: i32) -> (i32, i32) {
    %c0_i32 = arith.constant 0 : i32
    %c0_i32_0 = arith.constant 0 : i32
    %c0_i32_1 = arith.constant 0 : i32
    return %c0_i32, %c0_i32_0 : i32, i32
  }
  func.func @transform_9(%arg0: i32) -> (i32, i32) {
    %c0_i32 = arith.constant 0 : i32
    %c0_i32_0 = arith.constant 0 : i32
    %c0_i32_1 = arith.constant 0 : i32
    return %c0_i32, %c0_i32_0 : i32, i32
  }
  func.func @transform_10(%arg0: i32) -> (i32, i32) {
    %c0_i32 = arith.constant 0 : i32
    %c0_i32_0 = arith.constant 0 : i32
    %c0_i32_1 = arith.constant 0 : i32
    return %c0_i32, %c0_i32_0 : i32, i32
  }
  func.func @transform_11(%arg0: i32) -> (i32, i32, i32) {
    %c0_i32 = arith.constant 0 : i32
    %c0_i32_0 = arith.constant 0 : i32
    %c0_i32_1 = arith.constant 0 : i32
    return %c0_i32, %arg0, %c0_i32_0 : i32, i32, i32
  }
}

</mosaic_0001>

<bundles_post_ra>
// kernel: tpu_custom_call.1
= control target key start
LH: loop header
LB: loop body
LE: loop exit
PB: predicated region body
PF: predicated region fallthrough
CT: control target
= control target key end

     0   :  { %16 = vsyncpa [#allocation5], 0  ;;  %s3468_s0 = inlined_call_operand.hbm [shape: f32[8,8,128], index: 0, kind: input, shape index: {}]   ;;  %s3469_s1 = inlined_call_operand.hbm [shape: f32[128,128], index: 1, kind: input, shape index: {}]   ;;  %s3470_s2 = inlined_call_operand.vmem [shape: f32[1,128], index: 2, kind: input, shape index: {}]   ;;  %s3471_s3 = inlined_call_operand.vmem [shape: f32[1,128], index: 3, kind: input, shape index: {}]   ;;  %s3472_s4 = inlined_call_operand.vmem [shape: f32[1,128], index: 4, kind: input, shape index: {}]   ;;  %s3473_s5 = inlined_call_operand.hbm [shape: bf16[128,256], index: 5, kind: input, shape index: {}]   ;;  %s3474_s6 = inlined_call_operand.vmem [shape: f32[1,256], index: 6, kind: input, shape index: {}]   ;;  %s3475_s7 = inlined_call_operand.hbm [shape: bf16[128,128], index: 7, kind: input, shape index: {}]   ;;  %s3476_s8 = inlined_call_operand.vmem [shape: f32[1,128], index: 8, kind: input, shape index: {}]   ;;  %s3477_s9 = inlined_call_operand.hbm [shape: bf16[128,128], index: 9, kind: input, shape index: {}]   ;;  %s3478_s10 = inlined_call_operand.vmem [shape: f32[1,128], index: 10, kind: input, shape index: {}]   ;;  %s3479_s11 = inlined_call_operand.hbm [shape: f32[8,8,128], index: 11, kind: output, shape index: {}]  }
   0x1   :  { %17 = vsyncpa [#allocation8], 0 }
   0x2   :  { %18 = vsyncpa [#allocation11], 0 }
   0x3   :  { %19 = vsyncpa [#allocation6], 0  ;;  %s2797_s17 = smov [#allocation7]   ;;  %s2798_s19 = smov [#allocation10]  }
   0x4   :  { %s37_s18 = sshll.u32 %s2797_s17, 4  ;;  %s69_s20 = sshll.u32 %s2798_s19, 4  ;;  %s38_s18 = int_to_ptr.vmem [resolvable:$true] %s37_s18  ;;  %s2870_s20 = int_to_ptr.vmem [resolvable:$true] %s69_s20 }
   0x5   :  { %s2657_s23 = scalar_lea.hbm %s3469_s1, 2048 }
   0x6   :  { %p2658_p0 = scmp.ne.s32.totalorder %s3469_s1, %s2657_s23  ;;  %p2661_p1 = scmp.lt.u32.totalorder %s2657_s23, %s3469_s1 }
   0x8   :  { %p2663_p2 = pnand %p2661_p1, %p2658_p0 }
   0xa   :  { %2666 = shalt.err (!%p2663_p2)
}
   0xb   :  { %s2667_s28 = scalar_lea.vmem %s38_s18, 2048  ;;  %p2672_p4 = scmp.lt.s32.totalorder %s38_s18, %s38_s18 }
   0xc   :  { %p2668_p3 = scmp.ne.s32.totalorder %s38_s18, %s2667_s28  ;;  %p2673_p5 = scmp.lt.s32.totalorder %s2667_s28, %s2667_s28 }
   0xe   :  { %p2674_p6 = por %p2673_p5, %p2672_p4 }
  0x10   :  { %p2675_p7 = pnand %p2674_p6, %p2668_p3 }
  0x12   :  { %2678 = shalt.err (!%p2675_p7)
}
  0x13   :  { %s2799_s29 = smov 128   ;;  %s2800_s30 = smov 8  }
  0x14   :  { %43 = dma.hbm_to_vmem [thread:$0]  %s3469_s1, 2048, %s38_s18, [#allocation8], %s2799_s29, %s2799_s29, %s2800_s30  }
  0x15   :  { %s2679_s16 = scalar_lea.hbm %s3475_s7, 1024 }
  0x16   :  { %p2680_p8 = scmp.ne.s32.totalorder %s3475_s7, %s2679_s16  ;;  %p2683_p9 = scmp.lt.u32.totalorder %s2679_s16, %s3475_s7 }
  0x18   :  { %p2685_p10 = pnand %p2683_p9, %p2680_p8 }
  0x1a   :  { %2688 = shalt.err (!%p2685_p10)
}
  0x1b   :  { %s2689_s23 = scalar_lea.vmem %s2870_s20, 1024  ;;  %p2694_p12 = scmp.lt.s32.totalorder %s2870_s20, %s2870_s20 }
  0x1c   :  { %p2690_p11 = scmp.ne.s32.totalorder %s2870_s20, %s2689_s23  ;;  %p2695_p13 = scmp.lt.s32.totalorder %s2689_s23, %s2689_s23 }
  0x1e   :  { %p2696_p0 = por %p2695_p13, %p2694_p12 }
  0x20   :  { %p2697_p1 = pnand %p2696_p0, %p2690_p11 }
  0x22   :  { %2700 = shalt.err (!%p2697_p1)
}
  0x23   :  { %s2801_s1 = smov 64   ;;  %s2802_s18 = smov 4  }
  0x24   :  { %75 = dma.hbm_to_vmem [thread:$0]  %s3475_s7, 1024, %s2870_s20, [#allocation11], %s2801_s1, %s2801_s1, %s2802_s18  }
  0x25   :  { %s2803_s26 = smov [#allocation4]   ;;  %s2804_s28 = smov [#allocation9]  }
  0x26   :  { %s25_s27 = sshll.u32 %s2803_s26, 4  ;;  %s55_s12 = sshll.u32 %s2804_s28, 4  ;;  %s26_s27 = int_to_ptr.vmem [resolvable:$true] %s25_s27  ;;  %s2907_s12 = int_to_ptr.vmem [resolvable:$true] %s55_s12 }
  0x27   :  { %s2701_s15 = scalar_lea.hbm %s3468_s0, 1024 }
  0x28   :  { %p2702_p2 = scmp.ne.s32.totalorder %s3468_s0, %s2701_s15  ;;  %p2705_p3 = scmp.lt.u32.totalorder %s2701_s15, %s3468_s0 }
  0x2a   :  { %p2707_p4 = pnand %p2705_p3, %p2702_p2 }
  0x2c   :  { %2710 = shalt.err (!%p2707_p4)
}
  0x2d   :  { %s2711_s7 = scalar_lea.vmem %s26_s27, 1024  ;;  %p2716_p6 = scmp.lt.s32.totalorder %s26_s27, %s26_s27 }
  0x2e   :  { %p2712_p5 = scmp.ne.s32.totalorder %s26_s27, %s2711_s7  ;;  %p2717_p7 = scmp.lt.s32.totalorder %s2711_s7, %s2711_s7 }
  0x30   :  { %p2718_p8 = por %p2717_p7, %p2716_p6 }
  0x32   :  { %p2719_p9 = pnand %p2718_p8, %p2712_p5 }
  0x34   :  { %2722 = shalt.err (!%p2719_p9)
}
  0x35   :  { %31 = dma.hbm_to_vmem [thread:$0]  %s3468_s0, 1024, %s26_s27, [#allocation5], %s2799_s29, %s2799_s29, %s2800_s30  }
  0x36   :  { %s2723_s25 = scalar_lea.hbm %s3473_s5, 2048 }
  0x37   :  { %p2724_p10 = scmp.ne.s32.totalorder %s3473_s5, %s2723_s25  ;;  %p2727_p11 = scmp.lt.u32.totalorder %s2723_s25, %s3473_s5 }
  0x39   :  { %p2729_p12 = pnand %p2727_p11, %p2724_p10 }
  0x3b   :  { %2732 = shalt.err (!%p2729_p12)
}
  0x3c   :  { %s2733_s15 = scalar_lea.vmem %s2907_s12, 2048  ;;  %p2738_p0 = scmp.lt.s32.totalorder %s2907_s12, %s2907_s12 }
  0x3d   :  { %p2734_p13 = scmp.ne.s32.totalorder %s2907_s12, %s2733_s15  ;;  %p2739_p1 = scmp.lt.s32.totalorder %s2733_s15, %s2733_s15 }
  0x3f   :  { %p2740_p2 = por %p2739_p1, %p2738_p0 }
  0x41   :  { %p2741_p3 = pnand %p2740_p2, %p2734_p13 }
  0x43   :  { %2744 = shalt.err (!%p2741_p3)
}
  0x44   :  { %61 = dma.hbm_to_vmem [thread:$0]  %s3473_s5, 2048, %s2907_s12, [#allocation8], %s2799_s29, %s2799_s29, %s2800_s30  }
  0x45   :  { %s2805_s16 = smov [#allocation12]   ;;  %s2745_s7 = scalar_lea.hbm %s3477_s9, 1024 }
  0x46   :  { %s83_s17 = sshll.u32 %s2805_s16, 4  ;;  %p2746_p4 = scmp.ne.s32.totalorder %s3477_s9, %s2745_s7  ;;  %s84_s17 = int_to_ptr.vmem [resolvable:$true] %s83_s17 }
  0x47   :  { %p2749_p5 = scmp.lt.u32.totalorder %s2745_s7, %s3477_s9 }
  0x49   :  { %p2751_p6 = pnand %p2749_p5, %p2746_p4 }
  0x4b   :  { %2754 = shalt.err (!%p2751_p6)
}
  0x4c   :  { %s2755_s25 = scalar_lea.vmem %s84_s17, 1024  ;;  %p2760_p8 = scmp.lt.s32.totalorder %s84_s17, %s84_s17 }
  0x4d   :  { %p2756_p7 = scmp.ne.s32.totalorder %s84_s17, %s2755_s25  ;;  %p2761_p9 = scmp.lt.s32.totalorder %s2755_s25, %s2755_s25 }
  0x4f   :  { %p2762_p10 = por %p2761_p9, %p2760_p8 }
  0x51   :  { %p2763_p11 = pnand %p2762_p10, %p2756_p7 }
  0x53   :  { %2766 = shalt.err (!%p2763_p11)
}
  0x54   :  { %89 = dma.hbm_to_vmem [thread:$0]  %s3477_s9, 1024, %s84_s17, [#allocation11], %s2801_s1, %s2801_s1, %s2802_s18  }
  0x55   :  { %2789 = dma.done.wait [#allocation5], 1024  }
  0x56   :  { %2790 = vsyncadd [#allocation5], 4294966272 }
  0x57   :  { %2791 = dma.done.wait [#allocation8], 4096  }
  0x58   :  { %2792 = vsyncadd [#allocation8], 4294963200 }
  0x59   :  { %2793 = dma.done.wait [#allocation11], 2048  }
  0x5a   :  { %2794 = vsyncadd [#allocation11], 4294965248  ;;  %v116_v0 = vld [vmem:[#allocation7] sm:$0xff]  ;;  %v117_v1 = vld [vmem:[#allocation7 + $0x8] sm:$0xff]  ;;  %v2806_v55 = vmov 0   ;;  %vm2808_vm0 = vmmov 0  }
  0x5b   :  { %v118_v2 = vld [vmem:[#allocation7 + $0x10] sm:$0xff]  ;;  %v2458_v3 = vpack.c.bf16 %v117_v1, %v116_v0  ;;  %v119_v4 = vld [vmem:[#allocation7 + $0x18] sm:$0xff]  ;;  %v120_v6 = vld [vmem:[#allocation7 + $0x20] sm:$0xff]  ;;  %470 = vmatprep.mubr.bf16.mxu1 %v2806_v55  ;;  %s2809_s15 = smov [#allocation13]  }
  0x5c   :  { %v2462_v5 = vpack.c.bf16 %v119_v4, %v118_v2  ;;  %v121_v7 = vld [vmem:[#allocation7 + $0x28] sm:$0xff]  ;;  %v108_v9 = vld [vmem:[#allocation4] sm:$0xff]  ;;  %v122_v10 = vld [vmem:[#allocation7 + $0x30] sm:$0xff]  ;;  %s1956_s0 = sshll.u32 %s2809_s15, 4  ;;  %s1957_s0 = int_to_ptr.vmem [resolvable:$true] %s1956_s0 }
  0x5d   :  { %2459 = vmatprep.subr.bf16.mxu0 %v2458_v3  ;;  %v2466_v8 = vpack.c.bf16 %v121_v7, %v120_v6  ;;  %v123_v11 = vld [vmem:[#allocation7 + $0x38] sm:$0xff]  ;;  %2238 = vmatprep.mubr.f32.mxu0 %v108_v9  ;;  %v124_v12 = vld [vmem:[#allocation7 + $0x40] sm:$0xff]  ;;  %v125_v13 = vld [vmem:[#allocation7 + $0x48] sm:$0xff]  ;;  %p2772_p13 = scmp.lt.s32.totalorder %s1957_s0, %s1957_s0 }
  0x5e   :  { %2461 = vmatpush3.bf16.msra.mxu0 %v2458_v3  ;;  %v2470_v14 = vpack.c.bf16 %v123_v11, %v122_v10  ;;  %v126_v15 = vld [vmem:[#allocation7 + $0x50] sm:$0xff]  ;;  %v127_v16 = vld [vmem:[#allocation7 + $0x58] sm:$0xff]  ;;  %v2474_v17 = vpack.c.bf16 %v125_v13, %v124_v12  ;;  %v128_v18 = vld [vmem:[#allocation7 + $0x60] sm:$0xff] }
  0x5f   :  { %2463 = vmatprep.subr.bf16.mxu0 %v2462_v5  ;;  %v129_v19 = vld [vmem:[#allocation7 + $0x68] sm:$0xff]  ;;  %v2478_v20 = vpack.c.bf16 %v127_v16, %v126_v15  ;;  %v130_v21 = vld [vmem:[#allocation7 + $0x70] sm:$0xff]  ;;  %v131_v22 = vld [vmem:[#allocation7 + $0x78] sm:$0xff] }
  0x60   :  { %v2482_v23 = vpack.c.bf16 %v129_v19, %v128_v18  ;;  %v2486_v24 = vpack.c.bf16 %v131_v22, %v130_v21  ;;  %v109_v25 = vld [vmem:[#allocation4 + $0x8] sm:$0xff]  ;;  %v110_v26 = vld [vmem:[#allocation4 + $0x10] sm:$0xff]  ;;  %v111_v27 = vld [vmem:[#allocation4 + $0x18] sm:$0xff] }
  0x61   :  { %v112_v28 = vld [vmem:[#allocation4 + $0x20] sm:$0xff]  ;;  %v113_v29 = vld [vmem:[#allocation4 + $0x28] sm:$0xff]  ;;  %v114_v30 = vld [vmem:[#allocation4 + $0x30] sm:$0xff] }
  0x62   :  { %2465 = vmatpush3.bf16.msra.mxu0 %v2462_v5  ;;  %v115_v31 = vld [vmem:[#allocation4 + $0x38] sm:$0xff]  ;;  %v2959_v32 = vld [vmem:[#allocation9 + $0x4] ss:$8 sps:$4 sm:$0xff]   ;;  %v2961_v33 = vld [vmem:[#allocation9] ss:$8 sps:$4 sm:$0xff]  }
  0x63   :  { %2467 = vmatprep.subr.bf16.mxu0 %v2466_v8  ;;  %v2506_v34 = vld [vmem:[#allocation10] sm:$0xff]   ;;  %438 = vmatprep.subr.bf16.mxu1 %v2959_v32  ;;  %v2965_v35 = vld [vmem:[#allocation9 + $0x14] ss:$8 sps:$4 sm:$0xff]   ;;  %v2967_v36 = vld [vmem:[#allocation9 + $0x10] ss:$8 sps:$4 sm:$0xff]  }
  0x64   :  { %439 = vmatpush1.bf16.msra.mxu1 %v2961_v33  ;;  %v2510_v37 = vld [vmem:[#allocation10 + $0x8] sm:$0xff]   ;;  %v2514_v40 = vld [vmem:[#allocation10 + $0x10] sm:$0xff]   ;;  %v2518_v43 = vld [vmem:[#allocation10 + $0x18] sm:$0xff]  }
  0x65   :  { %440 = vmatprep.subr.bf16.mxu1 %v2965_v35  ;;  %v2971_v38 = vld [vmem:[#allocation9 + $0x24] ss:$8 sps:$4 sm:$0xff]   ;;  %v2973_v39 = vld [vmem:[#allocation9 + $0x20] ss:$8 sps:$4 sm:$0xff]   ;;  %v2977_v41 = vld [vmem:[#allocation9 + $0x34] ss:$8 sps:$4 sm:$0xff]  }
  0x66   :  { %2469 = vmatpush3.bf16.msra.mxu0 %v2466_v8  ;;  %v2979_v42 = vld [vmem:[#allocation9 + $0x30] ss:$8 sps:$4 sm:$0xff]   ;;  %v2983_v44 = vld [vmem:[#allocation9 + $0x44] ss:$8 sps:$4 sm:$0xff]   ;;  %v2985_v45 = vld [vmem:[#allocation9 + $0x40] ss:$8 sps:$4 sm:$0xff]  }
  0x67   :  { %2471 = vmatprep.subr.bf16.mxu0 %v2470_v14  ;;  %v2522_v46 = vld [vmem:[#allocation10 + $0x20] sm:$0xff]   ;;  %v2989_v47 = vld [vmem:[#allocation9 + $0x54] ss:$8 sps:$4 sm:$0xff]   ;;  %v2991_v48 = vld [vmem:[#allocation9 + $0x50] ss:$8 sps:$4 sm:$0xff]  }
  0x68   :  { %441 = vmatpush1.bf16.msra.mxu1 %v2967_v36  ;;  %v2526_v49 = vld [vmem:[#allocation10 + $0x28] sm:$0xff]   ;;  %v2530_v52 = vld [vmem:[#allocation10 + $0x30] sm:$0xff]   ;;  %v2534_v54 = vld [vmem:[#allocation10 + $0x38] sm:$0xff]  }
  0x69   :  { %442 = vmatprep.subr.bf16.mxu1 %v2971_v38  ;;  %v2995_v50 = vld [vmem:[#allocation9 + $0x64] ss:$8 sps:$4 sm:$0xff]   ;;  %v2997_v51 = vld [vmem:[#allocation9 + $0x60] ss:$8 sps:$4 sm:$0xff]   ;;  %v2999_v53 = vld [vmem:[#allocation9 + $0x74] ss:$8 sps:$4 sm:$0xff]  }
  0x6a   :  { %2473 = vmatpush3.bf16.msra.mxu0 %v2470_v14  ;;  %v3004_v56 = vld [vmem:[#allocation9 + $0x70] ss:$8 sps:$4 sm:$0xff]   ;;  %v1970_v57 = vld [vmem:[%s3470_s2] ss:$0 sm:$0xff] }
  0x6b   :  { %2475 = vmatprep.subr.bf16.mxu0 %v2474_v17 }
  0x6c   :  { %443 = vmatpush1.bf16.msra.mxu1 %v2973_v39 }
  0x6d   :  { %444 = vmatprep.subr.bf16.mxu1 %v2977_v41 }
  0x6e   :  { %2477 = vmatpush3.bf16.msra.mxu0 %v2474_v17 }
  0x6f   :  { %2479 = vmatprep.subr.bf16.mxu0 %v2478_v20 }
  0x70   :  { %445 = vmatpush1.bf16.msra.mxu1 %v2979_v42 }
  0x71   :  { %446 = vmatprep.subr.bf16.mxu1 %v2983_v44 }
  0x72   :  { %2481 = vmatpush3.bf16.msra.mxu0 %v2478_v20 }
  0x73   :  { %2483 = vmatprep.subr.bf16.mxu0 %v2482_v23 }
  0x74   :  { %447 = vmatpush1.bf16.msra.mxu1 %v2985_v45 }
  0x75   :  { %448 = vmatprep.subr.bf16.mxu1 %v2989_v47 }
  0x76   :  { %2485 = vmatpush3.bf16.msra.mxu0 %v2482_v23 }
  0x77   :  { %2487 = vmatprep.subr.bf16.mxu0 %v2486_v24 }
  0x78   :  { %449 = vmatpush1.bf16.msra.mxu1 %v2991_v48 }
  0x79   :  { %450 = vmatprep.subr.bf16.mxu1 %v2995_v50 }
  0x7a   :  { %2489 = vmatpush3.bf16.msra.mxu0 %v2486_v24 }
  0x7b   :  { %2250 = vmatprep.subr.bf16.mxu0 %v2506_v34 }
  0x7c   :  { %451 = vmatpush1.bf16.msra.mxu1 %v2997_v51 }
  0x7d   :  { %2239 = vmatmul.mubr.f32.vlgmr.msra.gmra.mrb[0].mxu0 %v109_v25  ;;  %452 = vmatprep.subr.bf16.mxu1 %v2999_v53 }
  0x7e   :  { %2241 = vmatprep.mubr.f32.mxu0 %v110_v26  ;;  %2251 = vmatpush3.bf16.msra.mxu0 %v2506_v34 }
  0x7f   :  { %2252 = vmatprep.subr.bf16.mxu0 %v2510_v37 }
  0x80   :  { %453 = vmatpush1.bf16.msra.mxu1 %v3004_v56 }
  0x81   :  { %2242 = vmatmul.mubr.f32.gmra.mrb[2].mxu0 %v111_v27  ;;  %851 = vmatprep.subr.bf16.mxu1 %v2959_v32 }
  0x82   :  { %2244 = vmatprep.mubr.f32.mxu0 %v112_v28  ;;  %2253 = vmatpush3.bf16.msra.mxu0 %v2510_v37 }
  0x83   :  { %2254 = vmatprep.subr.bf16.mxu0 %v2514_v40 }
  0x85   :  { %2245 = vmatmul.mubr.f32.gmra.mrb[4].mxu0 %v113_v29 }
  0x86   :  { %2247 = vmatprep.mubr.f32.mxu0 %v114_v30  ;;  %2255 = vmatpush3.bf16.msra.mxu0 %v2514_v40 }
  0x87   :  { %2256 = vmatprep.subr.bf16.mxu0 %v2518_v43 }
  0x89   :  { %2248 = vmatmul.mubr.f32.gmra.mrb[6].mxu0 %v115_v31 }
  0x8a   :  { %2257 = vmatpush3.bf16.msra.mxu0 %v2518_v43 }
  0x8b   :  { %2258 = vmatprep.subr.bf16.mxu0 %v2522_v46 }
  0x8e   :  { %2259 = vmatpush3.bf16.msra.mxu0 %v2522_v46 }
  0x8f   :  { %2260 = vmatprep.subr.bf16.mxu0 %v2526_v49 }
  0x92   :  { %2261 = vmatpush3.bf16.msra.mxu0 %v2526_v49 }
  0x93   :  { %2262 = vmatprep.subr.bf16.mxu0 %v2530_v52 }
  0x96   :  { %2263 = vmatpush3.bf16.msra.mxu0 %v2530_v52 }
  0x97   :  { %2264 = vmatprep.subr.bf16.mxu0 %v2534_v54 }
  0x9a   :  { %2265 = vmatpush3.bf16.msra.mxu0 %v2534_v54 }
 0x150   :  { %v2240_v58 = vpop.f32.mrb[0].mxu0 }
 0x151   :  { %v211_v59 = vadd.f32 %v2240_v58, %v1970_v57  ;;  %v205_v60 = vpop.f32.mrb[1].mxu0 }
 0x152   :  { %v206_v61 = vadd.f32 %v1970_v57, %v205_v60 }
 0x153   :  { %v253_v62 = vmul.f32 %v211_v59, %v211_v59 }
 0x154   :  { %v244_v63 = vadd.f32 %v211_v59, %v206_v61  ;;  %v252_v0 = vmul.f32 %v206_v61, %v206_v61  ;;  %v2243_v1 = vpop.f32.mrb[2].mxu0 }
 0x155   :  { %v215_v2 = vpop.f32.mrb[3].mxu0  ;;  %v221_v4 = vadd.f32 %v2243_v1, %v1970_v57  ;;  %v1971_v1 = vld [vmem:[%s3471_s3] ss:$0 sm:$0xff] }
 0x156   :  { %v260_v3 = vadd.f32 %v253_v62, %v252_v0  ;;  %v216_v5 = vadd.f32 %v1970_v57, %v215_v2 }
 0x157   :  { %v255_v11 = vmul.f32 %v221_v4, %v221_v4 }
 0x158   :  { %v245_v6 = vadd.f32 %v244_v63, %v216_v5  ;;  %v254_v7 = vmul.f32 %v216_v5, %v216_v5  ;;  %v2246_v8 = vpop.f32.mrb[4].mxu0 }
 0x159   :  { %v231_v9 = vadd.f32 %v2246_v8, %v1970_v57  ;;  %v225_v10 = vpop.f32.mrb[5].mxu0 }
 0x15a   :  { %v261_v12 = vadd.f32 %v260_v3, %v254_v7  ;;  %v226_v13 = vadd.f32 %v1970_v57, %v225_v10  ;;  %v246_v14 = vadd.f32 %v245_v6, %v221_v4 }
 0x15b   :  { %v257_v19 = vmul.f32 %v231_v9, %v231_v9 }
 0x15c   :  { %v247_v15 = vadd.f32 %v246_v14, %v226_v13  ;;  %v256_v16 = vmul.f32 %v226_v13, %v226_v13  ;;  %v262_v17 = vadd.f32 %v261_v12, %v255_v11  ;;  %v2249_v18 = vpop.f32.mrb[6].mxu0 }
 0x15d   :  { %v235_v20 = vpop.f32.mrb[7].mxu0  ;;  %v241_v22 = vadd.f32 %v2249_v18, %v1970_v57 }
 0x15e   :  { %v263_v21 = vadd.f32 %v262_v17, %v256_v16  ;;  %v236_v23 = vadd.f32 %v1970_v57, %v235_v20  ;;  %v248_v24 = vadd.f32 %v247_v15, %v231_v9 }
 0x15f   :  { %v259_v28 = vmul.f32 %v241_v22, %v241_v22 }
 0x160   :  { %v249_v25 = vadd.f32 %v248_v24, %v236_v23  ;;  %v258_v26 = vmul.f32 %v236_v23, %v236_v23  ;;  %v264_v27 = vadd.f32 %v263_v21, %v257_v19 }
 0x162   :  { %v250_v29 = vadd.f32 %v249_v25, %v241_v22  ;;  %v265_v30 = vadd.f32 %v264_v27, %v258_v26 }
 0x164   :  { %v251_v31 = vmul.f32 0.125, %v250_v29  ;;  %v266_v34 = vadd.f32 %v265_v30, %v259_v28 }
 0x166   :  { %v267_v37 = vmul.f32 0.125, %v266_v34  ;;  %v268_v40 = vmul.f32 %v251_v31, %v251_v31  ;;  %v276_v43 = vsub.f32 %v236_v23, %v251_v31  ;;  %v270_v46 = vsub.f32 %v206_v61, %v251_v31 }
 0x167   :  { %v271_v49 = vsub.f32 %v211_v59, %v251_v31  ;;  %v272_v52 = vsub.f32 %v216_v5, %v251_v31  ;;  %v273_v54 = vsub.f32 %v221_v4, %v251_v31  ;;  %v274_v58 = vsub.f32 %v226_v13, %v251_v31  ;;  %v1972_v59 = vld [vmem:[%s3472_s4] ss:$0 sm:$0xff] }
 0x168   :  { %v269_v60 = vsub.f32 %v267_v37, %v268_v40  ;;  %v275_v62 = vsub.f32 %v231_v9, %v251_v31  ;;  %v277_v57 = vsub.f32 %v241_v22, %v251_v31 }
 0x16a   :  { %v278_v63 = vadd.f32 1e-05, %v269_v60  ;;  %v3069_v60 = vld [vmem:[#allocation10 + $0x18] sm:$0xff]  }
 0x16c   :  { %2551 = vrsqrt.f32 %v278_v63  ;;  %v3081_v63 = vld [vmem:[#allocation10 + $0x30] sm:$0xff]  }
 0x176   :  { %v2552_v0 = vpop.eup %2551 }
 0x177   :  { %v286_v2 = vmul.f32 %v2552_v0, %v276_v43  ;;  %v280_v3 = vmul.f32 %v2552_v0, %v270_v46  ;;  %v281_v6 = vmul.f32 %v2552_v0, %v271_v49  ;;  %v282_v7 = vmul.f32 %v2552_v0, %v272_v52  ;;  %v3056_v49 = vld [vmem:[#allocation10] sm:$0xff]  }
 0x178   :  { %v283_v61 = vmul.f32 %v2552_v0, %v273_v54  ;;  %v284_v4 = vmul.f32 %v2552_v0, %v274_v58  ;;  %v285_v5 = vmul.f32 %v2552_v0, %v275_v62  ;;  %v287_v8 = vmul.f32 %v2552_v0, %v277_v57  ;;  %v3061_v54 = vld [vmem:[#allocation10 + $0x8] sm:$0xff]   ;;  %v3065_v58 = vld [vmem:[#allocation10 + $0x10] sm:$0xff]   ;;  %v3073_v62 = vld [vmem:[#allocation10 + $0x20] sm:$0xff]  }
 0x179   :  { %v295_v9 = vmul.f32 %v1971_v1, %v280_v3  ;;  %v296_v10 = vmul.f32 %v1971_v1, %v281_v6  ;;  %v297_v11 = vmul.f32 %v1971_v1, %v282_v7  ;;  %v301_v12 = vmul.f32 %v1971_v1, %v286_v2  ;;  %v3077_v57 = vld [vmem:[#allocation10 + $0x28] sm:$0xff]   ;;  %v3085_v0 = vld [vmem:[#allocation10 + $0x38] sm:$0xff]   ;;  %v346_v6 = vld [vmem:[%s3474_s6] sm:$0x3] }
 0x17a   :  { %v298_v13 = vmul.f32 %v1971_v1, %v283_v61  ;;  %v299_v14 = vmul.f32 %v1971_v1, %v284_v4  ;;  %v300_v15 = vmul.f32 %v1971_v1, %v285_v5  ;;  %v302_v16 = vmul.f32 %v1971_v1, %v287_v8 }
 0x17b   :  { %v310_v17 = vadd.f32 %v1972_v59, %v295_v9  ;;  %v311_v18 = vadd.f32 %v1972_v59, %v296_v10  ;;  %v312_v19 = vadd.f32 %v1972_v59, %v297_v11  ;;  %v316_v20 = vadd.f32 %v1972_v59, %v301_v12  ;;  %v1997_v10 = vld [vmem:[%s3476_s8] ss:$0 sm:$0xff] }
 0x17c   :  { %v313_v21 = vadd.f32 %v1972_v59, %v298_v13  ;;  %v314_v22 = vadd.f32 %v1972_v59, %v299_v14  ;;  %v315_v23 = vadd.f32 %v1972_v59, %v300_v15  ;;  %v317_v24 = vadd.f32 %v1972_v59, %v302_v16 }
 0x17d   :  { %v318_v25 = vmax.f32 %v310_v17, 0.0  ;;  %v319_v26 = vmax.f32 %v311_v18, 0.0  ;;  %v320_v27 = vmax.f32 %v312_v19, 0.0  ;;  %v324_v28 = vmax.f32 %v316_v20, 0.0 }
 0x17e   :  { %v321_v29 = vmax.f32 %v313_v21, 0.0  ;;  %v322_v30 = vmax.f32 %v314_v22, 0.0  ;;  %v323_v31 = vmax.f32 %v315_v23, 0.0  ;;  %v325_v34 = vmax.f32 %v317_v24, 0.0 }
 0x17f   :  { %v326_v37 = vpack.c.bf16 %v319_v26, %v318_v25  ;;  %v2807_v52 = vmov 0.0   ;;  %v348_v1 = vlaneseq }
 0x180   :  { %v327_v40 = vpack.c.bf16 %v321_v29, %v320_v27  ;;  %v328_v43 = vpack.c.bf16 %v323_v31, %v322_v30  ;;  %v329_v46 = vpack.c.bf16 %v325_v34, %v324_v28  ;;  %2274 = vmatprep.subr.bf16.mxu0 %v2807_v52 }
 0x181   :  { %471 = vmatmul.mubr.bf16.vlgmr.msra.gmra.mrb[0].mxu1 %v326_v37  ;;  %2266 = vmatprep.mubr.bf16.mxu0 %v326_v37  ;;  %v349_v2 = vshrl.u32 %v348_v1, 7 }
 0x182   :  { %2267 = vmatmul.mubr.bf16.vlgmr.msra.gmra.mrb[8].mxu0 %v327_v40  ;;  %852 = vmatpush1.bf16.msra.mxu1 %v2961_v33 }
 0x183   :  { %2270 = vmatprep.mubr.bf16.mxu0 %v328_v43  ;;  %853 = vmatprep.subr.bf16.mxu1 %v2965_v35  ;;  %v350_v3 = vsub.s32 0, %v349_v2  ;;  %v354_v7 = vsub.s32 1, %v349_v2 }
 0x184   :  { %480 = vmatprep.mubr.bf16.mxu1 %v2806_v55  ;;  %2275 = vmatpush3.bf16.msra.mxu0 %v3056_v49 }
 0x185   :  { %2276 = vmatprep.subr.bf16.mxu0 %v2807_v52  ;;  %v351_v59 = vrot.slane %v346_v6, %v350_v3  ;;  %v3094_v61 = vrot.slane %v346_v6, %v354_v7 }
 0x186   :  { %854 = vmatpush1.bf16.msra.mxu1 %v2967_v36 }
 0x187   :  { %855 = vmatprep.subr.bf16.mxu1 %v2971_v38 }
 0x188   :  { %2277 = vmatpush3.bf16.msra.mxu0 %v3061_v54 }
 0x189   :  { %481 = vmatmul.mubr.bf16.gmra.mrb[4].mxu1 %v327_v40  ;;  %2278 = vmatprep.subr.bf16.mxu0 %v2807_v52 }
 0x18a   :  { %2271 = vmatmul.mubr.bf16.gmra.mrb[12].mxu0 %v329_v46  ;;  %856 = vmatpush1.bf16.msra.mxu1 %v2973_v39 }
 0x18b   :  { %857 = vmatprep.subr.bf16.mxu1 %v2977_v41  ;;  %490 = vmatprep.mubr.bf16.mxu1 %v2806_v55 }
 0x18c   :  { %2279 = vmatpush3.bf16.msra.mxu0 %v3065_v58  ;;  %2290 = vmatprep.mubr.msk.bf16.mxu0 %vm2808_vm0, %v2807_v52 }
 0x18d   :  { %2280 = vmatprep.subr.bf16.mxu0 %v2807_v52 }
 0x18e   :  { %858 = vmatpush1.bf16.msra.mxu1 %v2979_v42 }
 0x18f   :  { %859 = vmatprep.subr.bf16.mxu1 %v2983_v44 }
 0x190   :  { %2281 = vmatpush3.bf16.msra.mxu0 %v3069_v60 }
 0x191   :  { %491 = vmatmul.mubr.bf16.gmra.mrb[8].mxu1 %v328_v43  ;;  %2282 = vmatprep.subr.bf16.mxu0 %v2807_v52 }
 0x192   :  { %860 = vmatpush1.bf16.msra.mxu1 %v2985_v45  ;;  %500 = vmatprep.mubr.bf16.mxu1 %v2806_v55 }
 0x193   :  { %861 = vmatprep.subr.bf16.mxu1 %v2989_v47 }
 0x194   :  { %2283 = vmatpush3.bf16.msra.mxu0 %v3073_v62 }
 0x195   :  { %2284 = vmatprep.subr.bf16.mxu0 %v2807_v52 }
 0x196   :  { %862 = vmatpush1.bf16.msra.mxu1 %v2991_v48 }
 0x197   :  { %863 = vmatprep.subr.bf16.mxu1 %v2995_v50 }
 0x198   :  { %2285 = vmatpush3.bf16.msra.mxu0 %v3077_v57 }
 0x199   :  { %501 = vmatmul.mubr.bf16.gmra.mrb[12].mxu1 %v329_v46  ;;  %2286 = vmatprep.subr.bf16.mxu0 %v2807_v52 }
 0x19a   :  { %864 = vmatpush1.bf16.msra.mxu1 %v2997_v51  ;;  %883 = vmatprep.mubr.bf16.mxu1 %v2806_v55 }
 0x19b   :  { %865 = vmatprep.subr.bf16.mxu1 %v2999_v53 }
 0x19c   :  { %2287 = vmatpush3.bf16.msra.mxu0 %v3081_v63 }
 0x19d   :  { %2288 = vmatprep.subr.bf16.mxu0 %v2807_v52 }
 0x19e   :  { %866 = vmatpush1.bf16.msra.mxu1 %v3004_v56 }
 0x19f   :  { %1012 = vmatprep.subr.bf16.mxu1 %v2959_v32 }
 0x1a0   :  { %2289 = vmatpush3.bf16.msra.mxu0 %v3085_v0 }
 0x1a1   :  { %884 = vmatmul.mubr.bf16.vlgmr.msra.gmra.mrb[16].mxu1 %v2806_v55  ;;  %2294 = vmatprep.subr.bf16.mxu0 %v2807_v52 }
 0x1a2   :  { %1013 = vmatpush1.bf16.msra.mxu1 %v2961_v33  ;;  %1044 = vmatprep.mubr.bf16.mxu1 %v2806_v55 }
 0x1a3   :  { %1014 = vmatprep.subr.bf16.mxu1 %v2965_v35 }
 0x1a6   :  { %1015 = vmatpush1.bf16.msra.mxu1 %v2967_v36 }
 0x1a7   :  { %1016 = vmatprep.subr.bf16.mxu1 %v2971_v38 }
 0x1aa   :  { %1017 = vmatpush1.bf16.msra.mxu1 %v2973_v39 }
 0x1ab   :  { %1018 = vmatprep.subr.bf16.mxu1 %v2977_v41 }
 0x1ae   :  { %1019 = vmatpush1.bf16.msra.mxu1 %v2979_v42 }
 0x1af   :  { %1020 = vmatprep.subr.bf16.mxu1 %v2983_v44 }
 0x1b2   :  { %1021 = vmatpush1.bf16.msra.mxu1 %v2985_v45 }
 0x1b3   :  { %1022 = vmatprep.subr.bf16.mxu1 %v2989_v47 }
 0x1b6   :  { %1023 = vmatpush1.bf16.msra.mxu1 %v2991_v48 }
 0x1b7   :  { %1024 = vmatprep.subr.bf16.mxu1 %v2995_v50 }
 0x1ba   :  { %1025 = vmatpush1.bf16.msra.mxu1 %v2997_v51 }
 0x1bb   :  { %1026 = vmatprep.subr.bf16.mxu1 %v2999_v53 }
 0x1be   :  { %1027 = vmatpush1.bf16.msra.mxu1 %v3004_v56 }
 0x1bf   :  { %1125 = vmatprep.subr.bf16.mxu1 %v2959_v32 }
 0x254   :  { %v472_v4 = vpop.f32.mrb[0].mxu1 }
 0x255   :  { %v473_v5 = vadd.f32 %v472_v4, %v351_v59  ;;  %v474_v8 = vpop.f32.mrb[1].mxu1  ;;  %v2268_v9 = vpop.f32.mrb[8].mxu0 }
 0x256   :  { %v475_v11 = vadd.f32 %v474_v8, %v3094_v61  ;;  %v476_v12 = vpop.f32.mrb[2].mxu1  ;;  %v688_v13 = vpop.f32.mrb[9].mxu0  ;;  %v697_v18 = vadd.f32 %v2268_v9, %v1997_v10 }
 0x257   :  { %v477_v14 = vadd.f32 %v476_v12, %v351_v59  ;;  %v478_v15 = vpop.f32.mrb[3].mxu1  ;;  %v2269_v16 = vpop.f32.mrb[10].mxu0  ;;  %v689_v22 = vadd.f32 %v1997_v10, %v688_v13 }
 0x258   :  { %v3100_v17 = vpack.c.bf16 %v475_v11, %v473_v5  ;;  %v479_v19 = vadd.f32 %v478_v15, %v3094_v61  ;;  %v700_v20 = vadd.f32 %v2269_v16, %v1997_v10  ;;  %v691_v21 = vpop.f32.mrb[11].mxu0 }
 0x259   :  { %v692_v23 = vadd.f32 %v1997_v10, %v691_v21 }
 0x25a   :  { %v3103_v24 = vpack.c.bf16 %v479_v19, %v477_v14  ;;  %v2071_v25 = vpack.c.bf16 %v700_v20, %v697_v18 }
 0x25b   :  { %v2066_v26 = vpack.c.bf16 %v692_v23, %v689_v22 }
 0x25c   :  { %2083 = vst [vmem:[#allocation3 + $0x8] sm:$0xff] %v2071_v25   ;;  %v482_v27 = vpop.f32.mrb[4].mxu1 }
 0x25d   :  { %2067 = vst [vmem:[#allocation3] sm:$0xff] %v2066_v26   ;;  %v483_v28 = vadd.f32 %v482_v27, %v351_v59  ;;  %v484_v29 = vpop.f32.mrb[5].mxu1  ;;  %v2272_v30 = vpop.f32.mrb[12].mxu0 }
 0x25e   :  { %v485_v31 = vadd.f32 %v484_v29, %v3094_v61  ;;  %v486_v34 = vpop.f32.mrb[6].mxu1  ;;  %v704_v37 = vpop.f32.mrb[13].mxu0  ;;  %v713_v2 = vadd.f32 %v2272_v30, %v1997_v10 }
 0x25f   :  { %v487_v40 = vadd.f32 %v486_v34, %v351_v59  ;;  %v488_v43 = vpop.f32.mrb[7].mxu1  ;;  %v2273_v46 = vpop.f32.mrb[14].mxu0  ;;  %v705_v4 = vadd.f32 %v1997_v10, %v704_v37 }
 0x260   :  { %v3106_v1 = vpack.c.bf16 %v485_v31, %v483_v28  ;;  %v489_v3 = vadd.f32 %v488_v43, %v3094_v61  ;;  %v716_v6 = vadd.f32 %v2273_v46, %v1997_v10  ;;  %v707_v7 = vpop.f32.mrb[15].mxu0 }
 0x261   :  { %v708_v5 = vadd.f32 %v1997_v10, %v707_v7 }
 0x262   :  { %v3109_v8 = vpack.c.bf16 %v489_v3, %v487_v40  ;;  %v2081_v9 = vpack.c.bf16 %v716_v6, %v713_v2 }
 0x263   :  { %v2076_v11 = vpack.c.bf16 %v708_v5, %v705_v4 }
 0x264   :  { %2085 = vst [vmem:[#allocation3 + $0x18] sm:$0xff] %v2081_v9   ;;  %v492_v12 = vpop.f32.mrb[8].mxu1 }
 0x265   :  { %2084 = vst [vmem:[#allocation3 + $0x10] sm:$0xff] %v2076_v11   ;;  %v493_v13 = vadd.f32 %v492_v12, %v351_v59  ;;  %v494_v14 = vpop.f32.mrb[9].mxu1 }
 0x266   :  { %v495_v15 = vadd.f32 %v494_v14, %v3094_v61  ;;  %v496_v16 = vpop.f32.mrb[10].mxu1 }
 0x267   :  { %v497_v18 = vadd.f32 %v496_v16, %v351_v59  ;;  %v498_v19 = vpop.f32.mrb[11].mxu1 }
 0x268   :  { %v3112_v20 = vpack.c.bf16 %v495_v15, %v493_v13  ;;  %v499_v21 = vadd.f32 %v498_v19, %v3094_v61 }
 0x26a   :  { %v3115_v22 = vpack.c.bf16 %v499_v21, %v497_v18 }
 0x26b   :  { %v3139_v15 = vld [vmem:[#allocation3 + $0x18] sm:$0xff]  }
 0x26c   :  { %v502_v10 = vpop.f32.mrb[12].mxu1  ;;  %v908_v16 = vunpack.c.h.bf16 %v3139_v15 }
 0x26d   :  { %v503_v23 = vadd.f32 %v502_v10, %v351_v59  ;;  %v504_v25 = vpop.f32.mrb[13].mxu1 }
 0x26e   :  { %v505_v26 = vadd.f32 %v504_v25, %v3094_v61  ;;  %v506_v27 = vpop.f32.mrb[14].mxu1 }
 0x26f   :  { %v507_v28 = vadd.f32 %v506_v27, %v351_v59  ;;  %v508_v29 = vpop.f32.mrb[15].mxu1 }
 0x270   :  { %v3118_v30 = vpack.c.bf16 %v505_v26, %v503_v23  ;;  %v509_v31 = vadd.f32 %v508_v29, %v3094_v61 }
 0x272   :  { %v2062_v34 = vpack.c.bf16 %v509_v31, %v507_v28 }
 0x274   :  { %v769_v37 = vunpack.c.l.bf16 %v2062_v34  ;;  %v885_v40 = vpop.f32.mrb[16].mxu1  ;;  %v770_v43 = vunpack.c.h.bf16 %v2062_v34 }
 0x275   :  { %v887_v46 = vpop.f32.mrb[17].mxu1 }
 0x276   :  { %v892_v2 = vadd.f32 %v885_v40, %v769_v37  ;;  %v893_v3 = vadd.f32 %v887_v46, %v770_v43  ;;  %v889_v6 = vpop.f32.mrb[18].mxu1  ;;  %v1009_v37 = vunpack.c.l.bf16 %v3118_v30  ;;  %v1010_v43 = vunpack.c.h.bf16 %v3118_v30 }
 0x277   :  { %v890_v7 = vpop.f32.mrb[19].mxu1 }
 0x278   :  { %v2022_v4 = vmul.f32 -1.442695, %v892_v2  ;;  %v2023_v61 = vmul.f32 -1.442695, %v893_v3 }
 0x27a   :  { %2553 = vpow2.f32 %v2022_v4 }
 0x284   :  { %v2554_v5 = vpop.eup %2553 }
 0x285   :  { %v897_v9 = vadd.f32 1.0, %v2554_v5 }
 0x287   :  { %2555 = vrcp.f32 %v897_v9 }
 0x288   :  { %2557 = vpow2.f32 %v2023_v61 }
 0x291   :  { %v2556_v59 = vpop.eup %2555 }
 0x292   :  { %v909_v11 = vmul.f32 0.0, %v2556_v59  ;;  %v2558_v13 = vpop.eup %2557 }
 0x293   :  { %v903_v14 = vadd.f32 1.0, %v2558_v13 }
 0x294   :  { %v910_v12 = vpack.c.bf16 %v909_v11, %v909_v11 }
 0x295   :  { %2559 = vrcp.f32 %v903_v14  ;;  %v1069_v14 = vunpack.c.l.bf16 %v3139_v15  ;;  %v1122_v15 = vunpack.c.l.bf16 %v3115_v22 }
 0x296   :  { %2291 = vmatmul.mubr.bf16.vlgmr.msra.gmra.mrb[16].mxu0 %v910_v12 }
 0x297   :  { %2295 = vmatpush3.bf16.msra.mxu0 %v3056_v49  ;;  %2310 = vmatprep.mubr.msk.bf16.mxu0 %vm2808_vm0, %v2807_v52 }
 0x298   :  { %2296 = vmatprep.subr.bf16.mxu0 %v2807_v52 }
 0x29b   :  { %2297 = vmatpush3.bf16.msra.mxu0 %v3061_v54 }
 0x29c   :  { %2298 = vmatprep.subr.bf16.mxu0 %v2807_v52 }
 0x29f   :  { %2299 = vmatpush3.bf16.msra.mxu0 %v3065_v58  ;;  %v2560_v25 = vpop.eup %2559 }
 0x2a0   :  { %2300 = vmatprep.subr.bf16.mxu0 %v2807_v52  ;;  %v1001_v26 = vsub.f32 1.0, %v2560_v25 }
 0x2a2   :  { %v1002_v28 = vmul.f32 0.0, %v1001_v26 }
 0x2a3   :  { %2301 = vmatpush3.bf16.msra.mxu0 %v3069_v60 }
 0x2a4   :  { %2302 = vmatprep.subr.bf16.mxu0 %v2807_v52 }
 0x2a7   :  { %2303 = vmatpush3.bf16.msra.mxu0 %v3073_v62 }
 0x2a8   :  { %2304 = vmatprep.subr.bf16.mxu0 %v2807_v52 }
 0x2ab   :  { %2305 = vmatpush3.bf16.msra.mxu0 %v3077_v57 }
 0x2ac   :  { %2306 = vmatprep.subr.bf16.mxu0 %v2807_v52 }
 0x2af   :  { %2307 = vmatpush3.bf16.msra.mxu0 %v3081_v63 }
 0x2b0   :  { %2308 = vmatprep.subr.bf16.mxu0 %v2807_v52 }
 0x2b3   :  { %2309 = vmatpush3.bf16.msra.mxu0 %v3085_v0 }
 0x2b4   :  { %2314 = vmatprep.subr.bf16.mxu0 %v2807_v52 }
 0x369   :  { %v993_v18 = vpop.f32.mrb[16].mxu0 }
 0x36a   :  { %v999_v19 = vadd.f32 %v993_v18, %v908_v16  ;;  %v2292_v21 = vpop.f32.mrb[17].mxu0 }
 0x36b   :  { %v996_v10 = vpop.f32.mrb[18].mxu0 }
 0x36c   :  { %2561 = vtanh.f32 %v999_v19  ;;  %v2293_v23 = vpop.f32.mrb[19].mxu0 }
 0x376   :  { %v2562_v27 = vpop.eup %2561 }
 0x377   :  { %v1003_v29 = vmul.f32 %v2562_v27, %v2560_v25 }
 0x379   :  { %v3142_v31 = vadd.f32 %v1003_v29, %v1002_v28 }
 0x37b   :  { %1006 = vst [vmem:[#allocation13 + $0x38] sm:$0xff] %v3142_v31  ;;  %v1011_v34 = vpack.c.bf16 %v3142_v31, %v3142_v31 }
 0x37d   :  { %1045 = vmatmul.mubr.bf16.vlgmr.msra.gmra.mrb[20].mxu1 %v1011_v34 }
 0x37e   :  { %1126 = vmatpush1.bf16.msra.mxu1 %v2961_v33  ;;  %1157 = vmatprep.mubr.bf16.mxu1 %v2806_v55 }
 0x37f   :  { %1127 = vmatprep.subr.bf16.mxu1 %v2965_v35 }
 0x382   :  { %1128 = vmatpush1.bf16.msra.mxu1 %v2967_v36 }
 0x383   :  { %1129 = vmatprep.subr.bf16.mxu1 %v2971_v38 }
 0x386   :  { %1130 = vmatpush1.bf16.msra.mxu1 %v2973_v39 }
 0x387   :  { %1131 = vmatprep.subr.bf16.mxu1 %v2977_v41 }
 0x38a   :  { %1132 = vmatpush1.bf16.msra.mxu1 %v2979_v42 }
 0x38b   :  { %1133 = vmatprep.subr.bf16.mxu1 %v2983_v44 }
 0x38e   :  { %1134 = vmatpush1.bf16.msra.mxu1 %v2985_v45 }
 0x38f   :  { %1135 = vmatprep.subr.bf16.mxu1 %v2989_v47 }
 0x392   :  { %1136 = vmatpush1.bf16.msra.mxu1 %v2991_v48 }
 0x393   :  { %1137 = vmatprep.subr.bf16.mxu1 %v2995_v50 }
 0x396   :  { %1138 = vmatpush1.bf16.msra.mxu1 %v2997_v51 }
 0x397   :  { %1139 = vmatprep.subr.bf16.mxu1 %v2999_v53 }
 0x39a   :  { %1140 = vmatpush1.bf16.msra.mxu1 %v3004_v56 }
 0x39b   :  { %1238 = vmatprep.subr.bf16.mxu1 %v2959_v32 }
 0x450   :  { %v1046_v40 = vpop.f32.mrb[20].mxu1 }
 0x451   :  { %v1053_v46 = vadd.f32 %v1046_v40, %v1009_v37  ;;  %v1048_v2 = vpop.f32.mrb[21].mxu1  ;;  %v1123_v37 = vunpack.c.h.bf16 %v3115_v22 }
 0x452   :  { %v1054_v3 = vadd.f32 %v1048_v2, %v1010_v43  ;;  %v1050_v6 = vpop.f32.mrb[22].mxu1 }
 0x453   :  { %v2032_v7 = vmul.f32 -1.442695, %v1053_v46  ;;  %v1051_v4 = vpop.f32.mrb[23].mxu1 }
 0x454   :  { %v2033_v30 = vmul.f32 -1.442695, %v1054_v3 }
 0x455   :  { %2563 = vpow2.f32 %v2032_v7 }
 0x45f   :  { %v2564_v5 = vpop.eup %2563 }
 0x460   :  { %v1058_v9 = vadd.f32 1.0, %v2564_v5 }
 0x462   :  { %2565 = vrcp.f32 %v1058_v9 }
 0x463   :  { %2567 = vpow2.f32 %v2033_v30 }
 0x46c   :  { %v2566_v59 = vpop.eup %2565 }
 0x46d   :  { %v1070_v11 = vmul.f32 %v2566_v59, %v3142_v31  ;;  %v2568_v61 = vpop.eup %2567 }
 0x46e   :  { %v1064_v13 = vadd.f32 1.0, %v2568_v61 }
 0x46f   :  { %v1071_v12 = vpack.c.bf16 %v1070_v11, %v1070_v11 }
 0x470   :  { %2569 = vrcp.f32 %v1064_v13 }
 0x471   :  { %2311 = vmatmul.mubr.bf16.vlgmr.msra.gmra.mrb[20].mxu0 %v1071_v12  ;;  %v3229_v12 = vld [vmem:[#allocation3 + $0x10] sm:$0xff]  }
 0x472   :  { %2315 = vmatpush3.bf16.msra.mxu0 %v3056_v49  ;;  %2330 = vmatprep.mubr.msk.bf16.mxu0 %vm2808_vm0, %v2807_v52  ;;  %v1182_v30 = vunpack.c.h.bf16 %v3229_v12 }
 0x473   :  { %2316 = vmatprep.subr.bf16.mxu0 %v2807_v52 }
 0x476   :  { %2317 = vmatpush3.bf16.msra.mxu0 %v3061_v54 }
 0x477   :  { %2318 = vmatprep.subr.bf16.mxu0 %v2807_v52 }
 0x47a   :  { %2319 = vmatpush3.bf16.msra.mxu0 %v3065_v58  ;;  %v2570_v23 = vpop.eup %2569 }
 0x47b   :  { %2320 = vmatprep.subr.bf16.mxu0 %v2807_v52  ;;  %v1114_v25 = vsub.f32 1.0, %v2570_v23 }
 0x47d   :  { %v1115_v27 = vmul.f32 %v1114_v25, %v3142_v31 }
 0x47e   :  { %2321 = vmatpush3.bf16.msra.mxu0 %v3069_v60 }
 0x47f   :  { %2322 = vmatprep.subr.bf16.mxu0 %v2807_v52 }
 0x482   :  { %2323 = vmatpush3.bf16.msra.mxu0 %v3073_v62 }
 0x483   :  { %2324 = vmatprep.subr.bf16.mxu0 %v2807_v52 }
 0x486   :  { %2325 = vmatpush3.bf16.msra.mxu0 %v3077_v57 }
 0x487   :  { %2326 = vmatprep.subr.bf16.mxu0 %v2807_v52 }
 0x48a   :  { %2327 = vmatpush3.bf16.msra.mxu0 %v3081_v63 }
 0x48b   :  { %2328 = vmatprep.subr.bf16.mxu0 %v2807_v52 }
 0x48e   :  { %2329 = vmatpush3.bf16.msra.mxu0 %v3085_v0 }
 0x48f   :  { %2334 = vmatprep.subr.bf16.mxu0 %v2807_v52 }
 0x544   :  { %v1106_v16 = vpop.f32.mrb[20].mxu0 }
 0x545   :  { %v1112_v18 = vadd.f32 %v1106_v16, %v1069_v14  ;;  %v2312_v19 = vpop.f32.mrb[21].mxu0 }
 0x546   :  { %v1109_v21 = vpop.f32.mrb[22].mxu0 }
 0x547   :  { %2571 = vtanh.f32 %v1112_v18  ;;  %v2313_v10 = vpop.f32.mrb[23].mxu0 }
 0x551   :  { %v2572_v26 = vpop.eup %2571 }
 0x552   :  { %v1116_v28 = vmul.f32 %v2572_v26, %v2570_v23 }
 0x554   :  { %v3187_v29 = vadd.f32 %v1116_v28, %v1115_v27 }
 0x556   :  { %v1124_v34 = vpack.c.bf16 %v3187_v29, %v3187_v29 }
 0x558   :  { %1158 = vmatmul.mubr.bf16.vlgmr.msra.gmra.mrb[24].mxu1 %v1124_v34 }
 0x559   :  { %1239 = vmatpush1.bf16.msra.mxu1 %v2961_v33  ;;  %1270 = vmatprep.mubr.bf16.mxu1 %v2806_v55 }
 0x55a   :  { %1240 = vmatprep.subr.bf16.mxu1 %v2965_v35 }
 0x55d   :  { %1241 = vmatpush1.bf16.msra.mxu1 %v2967_v36 }
 0x55e   :  { %1242 = vmatprep.subr.bf16.mxu1 %v2971_v38 }
 0x561   :  { %1243 = vmatpush1.bf16.msra.mxu1 %v2973_v39 }
 0x562   :  { %1244 = vmatprep.subr.bf16.mxu1 %v2977_v41 }
 0x565   :  { %1245 = vmatpush1.bf16.msra.mxu1 %v2979_v42 }
 0x566   :  { %1246 = vmatprep.subr.bf16.mxu1 %v2983_v44 }
 0x569   :  { %1247 = vmatpush1.bf16.msra.mxu1 %v2985_v45 }
 0x56a   :  { %1248 = vmatprep.subr.bf16.mxu1 %v2989_v47 }
 0x56d   :  { %1249 = vmatpush1.bf16.msra.mxu1 %v2991_v48 }
 0x56e   :  { %1250 = vmatprep.subr.bf16.mxu1 %v2995_v50 }
 0x571   :  { %1251 = vmatpush1.bf16.msra.mxu1 %v2997_v51 }
 0x572   :  { %1252 = vmatprep.subr.bf16.mxu1 %v2999_v53 }
 0x575   :  { %1253 = vmatpush1.bf16.msra.mxu1 %v3004_v56 }
 0x576   :  { %1351 = vmatprep.subr.bf16.mxu1 %v2959_v32 }
 0x62b   :  { %v1159_v31 = vpop.f32.mrb[24].mxu1 }
 0x62c   :  { %v1166_v40 = vadd.f32 %v1159_v31, %v1122_v15  ;;  %v1161_v43 = vpop.f32.mrb[25].mxu1  ;;  %v1295_v15 = vunpack.c.l.bf16 %v3229_v12  ;;  %v3296_v12 = vld [vmem:[#allocation9 + $0x20] ss:$8 sps:$4 sm:$0xff]  }
 0x62d   :  { %v1167_v46 = vadd.f32 %v1161_v43, %v1123_v37  ;;  %v1163_v2 = vpop.f32.mrb[26].mxu1 }
 0x62e   :  { %v2034_v3 = vmul.f32 -1.442695, %v1166_v40  ;;  %v1164_v6 = vpop.f32.mrb[27].mxu1 }
 0x62f   :  { %v2035_v32 = vmul.f32 -1.442695, %v1167_v46 }
 0x630   :  { %2573 = vpow2.f32 %v2034_v3 }
 0x63a   :  { %v2574_v7 = vpop.eup %2573 }
 0x63b   :  { %v1171_v4 = vadd.f32 1.0, %v2574_v7 }
 0x63d   :  { %2575 = vrcp.f32 %v1171_v4 }
 0x63e   :  { %2577 = vpow2.f32 %v2035_v32  ;;  %v3287_v32 = vld [vmem:[#allocation9 + $0x14] ss:$8 sps:$4 sm:$0xff]  }
 0x647   :  { %v2576_v5 = vpop.eup %2575 }
 0x648   :  { %v1183_v9 = vmul.f32 %v2576_v5, %v3187_v29  ;;  %v2578_v22 = vpop.eup %2577 }
 0x649   :  { %v1177_v11 = vadd.f32 1.0, %v2578_v22  ;;  %v3290_v22 = vld [vmem:[#allocation9 + $0x10] ss:$8 sps:$4 sm:$0xff]  }
 0x64a   :  { %v1184_v59 = vpack.c.bf16 %v1183_v9, %v1183_v9 }
 0x64b   :  { %2579 = vrcp.f32 %v1177_v11  ;;  %v3293_v11 = vld [vmem:[#allocation9 + $0x24] ss:$8 sps:$4 sm:$0xff]  }
 0x64c   :  { %2331 = vmatmul.mubr.bf16.vlgmr.msra.gmra.mrb[24].mxu0 %v1184_v59  ;;  %v3283_v59 = vld [vmem:[#allocation9] ss:$8 sps:$4 sm:$0xff]  }
 0x64d   :  { %2335 = vmatpush3.bf16.msra.mxu0 %v3056_v49  ;;  %2350 = vmatprep.mubr.msk.bf16.mxu0 %vm2808_vm0, %v2807_v52 }
 0x64e   :  { %2336 = vmatprep.subr.bf16.mxu0 %v2807_v52 }
 0x651   :  { %2337 = vmatpush3.bf16.msra.mxu0 %v3061_v54 }
 0x652   :  { %2338 = vmatprep.subr.bf16.mxu0 %v2807_v52 }
 0x655   :  { %2339 = vmatpush3.bf16.msra.mxu0 %v3065_v58  ;;  %v2580_v19 = vpop.eup %2579 }
 0x656   :  { %2340 = vmatprep.subr.bf16.mxu0 %v2807_v52  ;;  %v1227_v21 = vsub.f32 1.0, %v2580_v19 }
 0x658   :  { %v1228_v23 = vmul.f32 %v1227_v21, %v3187_v29  ;;  %v3320_v21 = vld [vmem:[#allocation9 + $0x60] ss:$8 sps:$4 sm:$0xff]  }
 0x659   :  { %2341 = vmatpush3.bf16.msra.mxu0 %v3069_v60 }
 0x65a   :  { %2342 = vmatprep.subr.bf16.mxu0 %v2807_v52 }
 0x65d   :  { %2343 = vmatpush3.bf16.msra.mxu0 %v3073_v62 }
 0x65e   :  { %2344 = vmatprep.subr.bf16.mxu0 %v2807_v52 }
 0x661   :  { %2345 = vmatpush3.bf16.msra.mxu0 %v3077_v57 }
 0x662   :  { %2346 = vmatprep.subr.bf16.mxu0 %v2807_v52 }
 0x665   :  { %2347 = vmatpush3.bf16.msra.mxu0 %v3081_v63 }
 0x666   :  { %2348 = vmatprep.subr.bf16.mxu0 %v2807_v52 }
 0x669   :  { %2349 = vmatpush3.bf16.msra.mxu0 %v3085_v0 }
 0x66a   :  { %2354 = vmatprep.subr.bf16.mxu0 %v2807_v52 }
 0x71f   :  { %v1219_v61 = vpop.f32.mrb[24].mxu0 }
 0x720   :  { %v1225_v13 = vadd.f32 %v1219_v61, %v1182_v30  ;;  %v2332_v14 = vpop.f32.mrb[25].mxu0  ;;  %v3299_v30 = vld [vmem:[#allocation9 + $0x34] ss:$8 sps:$4 sm:$0xff]   ;;  %v3302_v61 = vld [vmem:[#allocation9 + $0x30] ss:$8 sps:$4 sm:$0xff]  }
 0x721   :  { %v1222_v16 = vpop.f32.mrb[26].mxu0  ;;  %v3308_v14 = vld [vmem:[#allocation9 + $0x40] ss:$8 sps:$4 sm:$0xff]  }
 0x722   :  { %2581 = vtanh.f32 %v1225_v13  ;;  %v2333_v18 = vpop.f32.mrb[27].mxu0  ;;  %v3305_v13 = vld [vmem:[#allocation9 + $0x44] ss:$8 sps:$4 sm:$0xff]   ;;  %v3311_v16 = vld [vmem:[#allocation9 + $0x54] ss:$8 sps:$4 sm:$0xff]  }
 0x723   :  { %v3314_v18 = vld [vmem:[#allocation9 + $0x50] ss:$8 sps:$4 sm:$0xff]  }
 0x72c   :  { %v2582_v10 = vpop.eup %2581 }
 0x72d   :  { %v1229_v25 = vmul.f32 %v2582_v10, %v2580_v19  ;;  %v3317_v19 = vld [vmem:[#allocation9 + $0x64] ss:$8 sps:$4 sm:$0xff]   ;;  %v3323_v10 = vld [vmem:[#allocation9 + $0x74] ss:$8 sps:$4 sm:$0xff]  }
 0x72f   :  { %v3233_v26 = vadd.f32 %v1229_v25, %v1228_v23  ;;  %v3326_v23 = vld [vmem:[#allocation9 + $0x70] ss:$8 sps:$4 sm:$0xff]   ;;  %v1348_v25 = vunpack.c.l.bf16 %v3109_v8 }
 0x731   :  { %v1237_v27 = vpack.c.bf16 %v3233_v26, %v3233_v26 }
 0x733   :  { %1271 = vmatmul.mubr.bf16.vlgmr.msra.gmra.mrb[28].mxu1 %v1237_v27 }
 0x734   :  { %1352 = vmatpush1.bf16.msra.mxu1 %v2961_v33  ;;  %1383 = vmatprep.mubr.bf16.mxu1 %v2806_v55  ;;  %v3253_v33 = vld [vmem:[#allocation9 + $0x4] ss:$8 sps:$4 sm:$0xff]  }
 0x735   :  { %1353 = vmatprep.subr.bf16.mxu1 %v2965_v35  ;;  %v1235_v35 = vunpack.c.l.bf16 %v3112_v20 }
 0x738   :  { %1354 = vmatpush1.bf16.msra.mxu1 %v2967_v36 }
 0x739   :  { %1355 = vmatprep.subr.bf16.mxu1 %v2971_v38  ;;  %v1236_v38 = vunpack.c.h.bf16 %v3112_v20 }
 0x73c   :  { %1356 = vmatpush1.bf16.msra.mxu1 %v2973_v39 }
 0x73d   :  { %1357 = vmatprep.subr.bf16.mxu1 %v2977_v41 }
 0x740   :  { %1358 = vmatpush1.bf16.msra.mxu1 %v2979_v42 }
 0x741   :  { %1359 = vmatprep.subr.bf16.mxu1 %v2983_v44 }
 0x744   :  { %1360 = vmatpush1.bf16.msra.mxu1 %v2985_v45 }
 0x745   :  { %1361 = vmatprep.subr.bf16.mxu1 %v2989_v47 }
 0x748   :  { %1362 = vmatpush1.bf16.msra.mxu1 %v2991_v48 }
 0x749   :  { %1363 = vmatprep.subr.bf16.mxu1 %v2995_v50 }
 0x74c   :  { %1364 = vmatpush1.bf16.msra.mxu1 %v2997_v51 }
 0x74d   :  { %1365 = vmatprep.subr.bf16.mxu1 %v2999_v53 }
 0x750   :  { %1366 = vmatpush1.bf16.msra.mxu1 %v3004_v56 }
 0x751   :  { %1464 = vmatprep.subr.bf16.mxu1 %v3253_v33 }
 0x806   :  { %v1272_v36 = vpop.f32.mrb[28].mxu1 }
 0x807   :  { %v1279_v39 = vadd.f32 %v1272_v36, %v1235_v35  ;;  %v1274_v41 = vpop.f32.mrb[29].mxu1  ;;  %v1349_v35 = vunpack.c.h.bf16 %v3109_v8 }
 0x808   :  { %v1280_v42 = vadd.f32 %v1274_v41, %v1236_v38  ;;  %v1276_v44 = vpop.f32.mrb[30].mxu1 }
 0x809   :  { %v2036_v45 = vmul.f32 -1.442695, %v1279_v39  ;;  %v1277_v47 = vpop.f32.mrb[31].mxu1 }
 0x80a   :  { %v2037_v20 = vmul.f32 -1.442695, %v1280_v42 }
 0x80b   :  { %2583 = vpow2.f32 %v2036_v45 }
 0x815   :  { %v2584_v48 = vpop.eup %2583 }
 0x816   :  { %v1284_v50 = vadd.f32 1.0, %v2584_v48 }
 0x818   :  { %2585 = vrcp.f32 %v1284_v50 }
 0x819   :  { %2587 = vpow2.f32 %v2037_v20  ;;  %v3351_v20 = vld [vmem:[#allocation3 + $0x8] sm:$0xff]  }
 0x822   :  { %v2586_v51 = vpop.eup %2585 }
 0x823   :  { %v1296_v53 = vmul.f32 %v2586_v51, %v3233_v26  ;;  %v2588_v28 = vpop.eup %2587 }
 0x824   :  { %v1290_v34 = vadd.f32 1.0, %v2588_v28  ;;  %v1408_v28 = vunpack.c.h.bf16 %v3351_v20 }
 0x825   :  { %v1297_v56 = vpack.c.bf16 %v1296_v53, %v1296_v53 }
 0x826   :  { %2589 = vrcp.f32 %v1290_v34 }
 0x827   :  { %2351 = vmatmul.mubr.bf16.vlgmr.msra.gmra.mrb[28].mxu0 %v1297_v56 }
 0x828   :  { %2355 = vmatpush3.bf16.msra.mxu0 %v3056_v49  ;;  %2370 = vmatprep.mubr.msk.bf16.mxu0 %vm2808_vm0, %v2807_v52 }
 0x829   :  { %2356 = vmatprep.subr.bf16.mxu0 %v2807_v52 }
 0x82c   :  { %2357 = vmatpush3.bf16.msra.mxu0 %v3061_v54 }
 0x82d   :  { %2358 = vmatprep.subr.bf16.mxu0 %v2807_v52 }
 0x830   :  { %2359 = vmatpush3.bf16.msra.mxu0 %v3065_v58  ;;  %v2590_v2 = vpop.eup %2589 }
 0x831   :  { %2360 = vmatprep.subr.bf16.mxu0 %v2807_v52  ;;  %v1340_v3 = vsub.f32 1.0, %v2590_v2 }
 0x833   :  { %v1341_v7 = vmul.f32 %v1340_v3, %v3233_v26 }
 0x834   :  { %2361 = vmatpush3.bf16.msra.mxu0 %v3069_v60 }
 0x835   :  { %2362 = vmatprep.subr.bf16.mxu0 %v2807_v52 }
 0x838   :  { %2363 = vmatpush3.bf16.msra.mxu0 %v3073_v62 }
 0x839   :  { %2364 = vmatprep.subr.bf16.mxu0 %v2807_v52 }
 0x83c   :  { %2365 = vmatpush3.bf16.msra.mxu0 %v3077_v57 }
 0x83d   :  { %2366 = vmatprep.subr.bf16.mxu0 %v2807_v52 }
 0x840   :  { %2367 = vmatpush3.bf16.msra.mxu0 %v3081_v63 }
 0x841   :  { %2368 = vmatprep.subr.bf16.mxu0 %v2807_v52 }
 0x844   :  { %2369 = vmatpush3.bf16.msra.mxu0 %v3085_v0 }
 0x845   :  { %2374 = vmatprep.subr.bf16.mxu0 %v2807_v52 }
 0x8fa   :  { %v1332_v31 = vpop.f32.mrb[28].mxu0 }
 0x8fb   :  { %v1338_v37 = vadd.f32 %v1332_v31, %v1295_v15  ;;  %v2352_v40 = vpop.f32.mrb[29].mxu0 }
 0x8fc   :  { %v1335_v43 = vpop.f32.mrb[30].mxu0 }
 0x8fd   :  { %2591 = vtanh.f32 %v1338_v37  ;;  %v2353_v46 = vpop.f32.mrb[31].mxu0 }
 0x907   :  { %v2592_v6 = vpop.eup %2591 }
 0x908   :  { %v1342_v4 = vmul.f32 %v2592_v6, %v2590_v2 }
 0x90a   :  { %v3279_v5 = vadd.f32 %v1342_v4, %v1341_v7 }
 0x90c   :  { %v1350_v9 = vpack.c.bf16 %v3279_v5, %v3279_v5 }
 0x90e   :  { %1384 = vmatmul.mubr.bf16.vlgmr.msra.gmra.mrb[32].mxu1 %v1350_v9  ;;  %v1461_v9 = vunpack.c.l.bf16 %v3106_v1 }
 0x90f   :  { %1465 = vmatpush1.bf16.msra.mxu1 %v3283_v59  ;;  %1496 = vmatprep.mubr.bf16.mxu1 %v2806_v55 }
 0x910   :  { %1466 = vmatprep.subr.bf16.mxu1 %v3287_v32 }
 0x913   :  { %1467 = vmatpush1.bf16.msra.mxu1 %v3290_v22 }
 0x914   :  { %1468 = vmatprep.subr.bf16.mxu1 %v3293_v11 }
 0x917   :  { %1469 = vmatpush1.bf16.msra.mxu1 %v3296_v12 }
 0x918   :  { %1470 = vmatprep.subr.bf16.mxu1 %v3299_v30 }
 0x91b   :  { %1471 = vmatpush1.bf16.msra.mxu1 %v3302_v61 }
 0x91c   :  { %1472 = vmatprep.subr.bf16.mxu1 %v3305_v13 }
 0x91f   :  { %1473 = vmatpush1.bf16.msra.mxu1 %v3308_v14 }
 0x920   :  { %1474 = vmatprep.subr.bf16.mxu1 %v3311_v16 }
 0x923   :  { %1475 = vmatpush1.bf16.msra.mxu1 %v3314_v18 }
 0x924   :  { %1476 = vmatprep.subr.bf16.mxu1 %v3317_v19 }
 0x927   :  { %1477 = vmatpush1.bf16.msra.mxu1 %v3320_v21 }
 0x928   :  { %1478 = vmatprep.subr.bf16.mxu1 %v3323_v10 }
 0x92b   :  { %1479 = vmatpush1.bf16.msra.mxu1 %v3326_v23 }
 0x92c   :  { %1577 = vmatprep.subr.bf16.mxu1 %v3253_v33 }
 0x9e1   :  { %v1385_v27 = vpop.f32.mrb[32].mxu1 }
 0x9e2   :  { %v1392_v36 = vadd.f32 %v1385_v27, %v1348_v25  ;;  %v1387_v38 = vpop.f32.mrb[33].mxu1  ;;  %v1462_v27 = vunpack.c.h.bf16 %v3106_v1 }
 0x9e3   :  { %v1393_v39 = vadd.f32 %v1387_v38, %v1349_v35  ;;  %v1389_v41 = vpop.f32.mrb[34].mxu1 }
 0x9e4   :  { %v2038_v42 = vmul.f32 -1.442695, %v1392_v36  ;;  %v1390_v44 = vpop.f32.mrb[35].mxu1 }
 0x9e5   :  { %v2039_v8 = vmul.f32 -1.442695, %v1393_v39 }
 0x9e6   :  { %2593 = vpow2.f32 %v2038_v42 }
 0x9f0   :  { %v2594_v45 = vpop.eup %2593 }
 0x9f1   :  { %v1397_v47 = vadd.f32 1.0, %v2594_v45 }
 0x9f3   :  { %2595 = vrcp.f32 %v1397_v47 }
 0x9f4   :  { %2597 = vpow2.f32 %v2039_v8 }
 0x9fd   :  { %v2596_v48 = vpop.eup %2595 }
 0x9fe   :  { %v1409_v50 = vmul.f32 %v2596_v48, %v3279_v5  ;;  %v2598_v53 = vpop.eup %2597 }
 0x9ff   :  { %v1403_v56 = vadd.f32 1.0, %v2598_v53 }
 0xa00   :  { %v1410_v51 = vpack.c.bf16 %v1409_v50, %v1409_v50 }
 0xa01   :  { %2599 = vrcp.f32 %v1403_v56 }
 0xa02   :  { %2371 = vmatmul.mubr.bf16.vlgmr.msra.gmra.mrb[32].mxu0 %v1410_v51 }
 0xa03   :  { %2375 = vmatpush3.bf16.msra.mxu0 %v3056_v49  ;;  %2390 = vmatprep.mubr.msk.bf16.mxu0 %vm2808_vm0, %v2807_v52 }
 0xa04   :  { %2376 = vmatprep.subr.bf16.mxu0 %v2807_v52 }
 0xa07   :  { %2377 = vmatpush3.bf16.msra.mxu0 %v3061_v54 }
 0xa08   :  { %2378 = vmatprep.subr.bf16.mxu0 %v2807_v52 }
 0xa0b   :  { %2379 = vmatpush3.bf16.msra.mxu0 %v3065_v58  ;;  %v2600_v43 = vpop.eup %2599 }
 0xa0c   :  { %2380 = vmatprep.subr.bf16.mxu0 %v2807_v52  ;;  %v1453_v46 = vsub.f32 1.0, %v2600_v43 }
 0xa0e   :  { %v1454_v3 = vmul.f32 %v1453_v46, %v3279_v5 }
 0xa0f   :  { %2381 = vmatpush3.bf16.msra.mxu0 %v3069_v60 }
 0xa10   :  { %2382 = vmatprep.subr.bf16.mxu0 %v2807_v52 }
 0xa13   :  { %2383 = vmatpush3.bf16.msra.mxu0 %v3073_v62 }
 0xa14   :  { %2384 = vmatprep.subr.bf16.mxu0 %v2807_v52 }
 0xa17   :  { %2385 = vmatpush3.bf16.msra.mxu0 %v3077_v57 }
 0xa18   :  { %2386 = vmatprep.subr.bf16.mxu0 %v2807_v52 }
 0xa1b   :  { %2387 = vmatpush3.bf16.msra.mxu0 %v3081_v63 }
 0xa1c   :  { %2388 = vmatprep.subr.bf16.mxu0 %v2807_v52 }
 0xa1f   :  { %2389 = vmatpush3.bf16.msra.mxu0 %v3085_v0 }
 0xa20   :  { %2394 = vmatprep.subr.bf16.mxu0 %v2807_v52 }
 0xad5   :  { %v1445_v34 = vpop.f32.mrb[32].mxu0 }
 0xad6   :  { %v1451_v15 = vadd.f32 %v1445_v34, %v1408_v28  ;;  %v2372_v31 = vpop.f32.mrb[33].mxu0 }
 0xad7   :  { %v1448_v37 = vpop.f32.mrb[34].mxu0  ;;  %v2654_v31 = vld [vmem:[#allocation10 + $0x28] sm:$0xff]  }
 0xad8   :  { %2601 = vtanh.f32 %v1451_v15  ;;  %v2373_v40 = vpop.f32.mrb[35].mxu0  ;;  %v2653_v15 = vld [vmem:[#allocation10 + $0x20] sm:$0xff]   ;;  %v2655_v37 = vld [vmem:[#allocation10 + $0x30] sm:$0xff]  }
 0xad9   :  { %v2656_v40 = vld [vmem:[#allocation10 + $0x38] sm:$0xff]  }
 0xae2   :  { %v2602_v2 = vpop.eup %2601 }
 0xae3   :  { %v1455_v6 = vmul.f32 %v2602_v2, %v2600_v43 }
 0xae5   :  { %v3355_v7 = vadd.f32 %v1455_v6, %v1454_v3  ;;  %v3431_v3 = vld [vmem:[#allocation3] sm:$0xff]  }
 0xae6   :  { %v1634_v6 = vunpack.c.h.bf16 %v3431_v3 }
 0xae7   :  { %v1463_v4 = vpack.c.bf16 %v3355_v7, %v3355_v7 }
 0xae9   :  { %1497 = vmatmul.mubr.bf16.vlgmr.msra.gmra.mrb[36].mxu1 %v1463_v4 }
 0xaea   :  { %1578 = vmatpush1.bf16.msra.mxu1 %v3283_v59  ;;  %1609 = vmatprep.mubr.bf16.mxu1 %v2806_v55 }
 0xaeb   :  { %1579 = vmatprep.subr.bf16.mxu1 %v3287_v32 }
 0xaee   :  { %1580 = vmatpush1.bf16.msra.mxu1 %v3290_v22 }
 0xaef   :  { %1581 = vmatprep.subr.bf16.mxu1 %v3293_v11 }
 0xaf2   :  { %1582 = vmatpush1.bf16.msra.mxu1 %v3296_v12 }
 0xaf3   :  { %1583 = vmatprep.subr.bf16.mxu1 %v3299_v30 }
 0xaf6   :  { %1584 = vmatpush1.bf16.msra.mxu1 %v3302_v61 }
 0xaf7   :  { %1585 = vmatprep.subr.bf16.mxu1 %v3305_v13 }
 0xafa   :  { %1586 = vmatpush1.bf16.msra.mxu1 %v3308_v14 }
 0xafb   :  { %1587 = vmatprep.subr.bf16.mxu1 %v3311_v16 }
 0xafe   :  { %1588 = vmatpush1.bf16.msra.mxu1 %v3314_v18 }
 0xaff   :  { %1589 = vmatprep.subr.bf16.mxu1 %v3317_v19 }
 0xb02   :  { %1590 = vmatpush1.bf16.msra.mxu1 %v3320_v21 }
 0xb03   :  { %1591 = vmatprep.subr.bf16.mxu1 %v3323_v10 }
 0xb06   :  { %1592 = vmatpush1.bf16.msra.mxu1 %v3326_v23 }
 0xb07   :  { %1689 = vmatprep.subr.bf16.mxu1 %v3253_v33 }
 0xbbc   :  { %v1498_v25 = vpop.f32.mrb[36].mxu1 }
 0xbbd   :  { %v1505_v35 = vadd.f32 %v1498_v25, %v1461_v9  ;;  %v1500_v36 = vpop.f32.mrb[37].mxu1 }
 0xbbe   :  { %v1506_v38 = vadd.f32 %v1500_v36, %v1462_v27  ;;  %v1502_v39 = vpop.f32.mrb[38].mxu1 }
 0xbbf   :  { %v2040_v41 = vmul.f32 -1.442695, %v1505_v35  ;;  %v1503_v42 = vpop.f32.mrb[39].mxu1 }
 0xbc1   :  { %2603 = vpow2.f32 %v2040_v41 }
 0xbcb   :  { %v2604_v44 = vpop.eup %2603 }
 0xbcc   :  { %v1510_v45 = vadd.f32 1.0, %v2604_v44 }
 0xbce   :  { %2605 = vrcp.f32 %v1510_v45  ;;  %v2543_v45 = vld [vmem:[#allocation12] sm:$0xff]  }
 0xbd8   :  { %v2606_v47 = vpop.eup %2605 }
 0xbd9   :  { %v1522_v48 = vmul.f32 %v2606_v47, %v3355_v7  ;;  %v1686_v47 = vunpack.c.l.bf16 %v3100_v17 }
 0xbdb   :  { %v1523_v50 = vpack.c.bf16 %v1522_v48, %v1522_v48 }
 0xbdd   :  { %2391 = vmatmul.mubr.bf16.vlgmr.msra.gmra.mrb[36].mxu0 %v1523_v50  ;;  %v1687_v50 = vunpack.c.h.bf16 %v3100_v17  ;;  %v2546_v17 = vld [vmem:[#allocation12 + $0x18] sm:$0xff]  }
 0xbde   :  { %2395 = vmatpush3.bf16.msra.mxu0 %v3056_v49  ;;  %2410 = vmatprep.mubr.msk.bf16.mxu0 %vm2808_vm0, %v2807_v52  ;;  %v2041_v49 = vmul.f32 -1.442695, %v1506_v38 }
 0xbdf   :  { %2396 = vmatprep.subr.bf16.mxu0 %v2807_v52 }
 0xbe0   :  { %2607 = vpow2.f32 %v2041_v49 }
 0xbe2   :  { %2397 = vmatpush3.bf16.msra.mxu0 %v3061_v54 }
 0xbe3   :  { %2398 = vmatprep.subr.bf16.mxu0 %v2807_v52 }
 0xbe6   :  { %2399 = vmatpush3.bf16.msra.mxu0 %v3065_v58 }
 0xbe7   :  { %2400 = vmatprep.subr.bf16.mxu0 %v2807_v52 }
 0xbea   :  { %2401 = vmatpush3.bf16.msra.mxu0 %v3069_v60  ;;  %v2608_v54 = vpop.eup %2607  ;;  %v1521_v60 = vunpack.c.l.bf16 %v3351_v20  ;;  %v2652_v20 = vld [vmem:[#allocation10 + $0x18] sm:$0xff]  }
 0xbeb   :  { %2402 = vmatprep.subr.bf16.mxu0 %v2807_v52  ;;  %v1516_v58 = vadd.f32 1.0, %v2608_v54 }
 0xbed   :  { %2609 = vrcp.f32 %v1516_v58 }
 0xbee   :  { %2403 = vmatpush3.bf16.msra.mxu0 %v3073_v62 }
 0xbef   :  { %2404 = vmatprep.subr.bf16.mxu0 %v2807_v52 }
 0xbf2   :  { %2405 = vmatpush3.bf16.msra.mxu0 %v3077_v57 }
 0xbf3   :  { %2406 = vmatprep.subr.bf16.mxu0 %v2807_v52 }
 0xbf6   :  { %2407 = vmatpush3.bf16.msra.mxu0 %v3081_v63 }
 0xbf7   :  { %2408 = vmatprep.subr.bf16.mxu0 %v2807_v52  ;;  %v2610_v63 = vpop.eup %2609 }
 0xbf8   :  { %v1566_v8 = vsub.f32 1.0, %v2610_v63 }
 0xbfa   :  { %2409 = vmatpush3.bf16.msra.mxu0 %v3085_v0  ;;  %v1567_v0 = vmul.f32 %v1566_v8, %v3355_v7 }
 0xbfb   :  { %2414 = vmatprep.subr.bf16.mxu0 %v2807_v52 }
 0xcb0   :  { %v1558_v62 = vpop.f32.mrb[36].mxu0 }
 0xcb1   :  { %v1564_v1 = vadd.f32 %v1558_v62, %v1521_v60  ;;  %v2392_v57 = vpop.f32.mrb[37].mxu0 }
 0xcb2   :  { %v1561_v33 = vpop.f32.mrb[38].mxu0 }
 0xcb3   :  { %2611 = vtanh.f32 %v1564_v1  ;;  %v2393_v51 = vpop.f32.mrb[39].mxu0 }
 0xcbd   :  { %v2612_v53 = vpop.eup %2611 }
 0xcbe   :  { %v1568_v56 = vmul.f32 %v2612_v53, %v2610_v63  ;;  %v2544_v53 = vld [vmem:[#allocation12 + $0x8] sm:$0xff]  }
 0xcc0   :  { %v3399_v28 = vadd.f32 %v1568_v56, %v1567_v0  ;;  %v2545_v0 = vld [vmem:[#allocation12 + $0x10] sm:$0xff]   ;;  %v2547_v56 = vld [vmem:[#allocation12 + $0x20] sm:$0xff]  }
 0xcc2   :  { %v1576_v34 = vpack.c.bf16 %v3399_v28, %v3399_v28 }
 0xcc4   :  { %1610 = vmatmul.mubr.bf16.vlgmr.msra.gmra.mrb[40].mxu1 %v1576_v34  ;;  %v2548_v34 = vld [vmem:[#allocation12 + $0x28] sm:$0xff]  }
 0xcc5   :  { %1690 = vmatpush1.bf16.msra.mxu1 %v3283_v59  ;;  %1721 = vmatprep.mubr.bf16.mxu1 %v2806_v55  ;;  %v1574_v55 = vunpack.c.l.bf16 %v3103_v24 }
 0xcc6   :  { %1691 = vmatprep.subr.bf16.mxu1 %v3287_v32  ;;  %v1575_v32 = vunpack.c.h.bf16 %v3103_v24  ;;  %v2650_v24 = vld [vmem:[#allocation10 + $0x8] sm:$0xff]  }
 0xcc9   :  { %1692 = vmatpush1.bf16.msra.mxu1 %v3290_v22 }
 0xcca   :  { %1693 = vmatprep.subr.bf16.mxu1 %v3293_v11 }
 0xccd   :  { %1694 = vmatpush1.bf16.msra.mxu1 %v3296_v12 }
 0xcce   :  { %1695 = vmatprep.subr.bf16.mxu1 %v3299_v30 }
 0xcd1   :  { %1696 = vmatpush1.bf16.msra.mxu1 %v3302_v61 }
 0xcd2   :  { %1697 = vmatprep.subr.bf16.mxu1 %v3305_v13 }
 0xcd5   :  { %1698 = vmatpush1.bf16.msra.mxu1 %v3308_v14 }
 0xcd6   :  { %1699 = vmatprep.subr.bf16.mxu1 %v3311_v16 }
 0xcd9   :  { %1700 = vmatpush1.bf16.msra.mxu1 %v3314_v18 }
 0xcda   :  { %1701 = vmatprep.subr.bf16.mxu1 %v3317_v19 }
 0xcdd   :  { %1702 = vmatpush1.bf16.msra.mxu1 %v3320_v21 }
 0xcde   :  { %1703 = vmatprep.subr.bf16.mxu1 %v3323_v10  ;;  %v2649_v10 = vld [vmem:[#allocation10] sm:$0xff]  }
 0xce1   :  { %1704 = vmatpush1.bf16.msra.mxu1 %v3326_v23  ;;  %v2651_v23 = vld [vmem:[#allocation10 + $0x10] sm:$0xff]  }
 0xce2   :  { %2434 = vmatprep.subr.bf16.mxu1 %v2543_v45 }
 0xd97   :  { %v1611_v59 = vpop.f32.mrb[40].mxu1 }
 0xd98   :  { %v1618_v22 = vadd.f32 %v1611_v59, %v1574_v55  ;;  %v1613_v11 = vpop.f32.mrb[41].mxu1  ;;  %v2549_v55 = vld [vmem:[#allocation12 + $0x30] sm:$0xff]   ;;  %v2550_v59 = vld [vmem:[#allocation12 + $0x38] sm:$0xff]  }
 0xd99   :  { %v1619_v12 = vadd.f32 %v1613_v11, %v1575_v32  ;;  %v1615_v30 = vpop.f32.mrb[42].mxu1 }
 0xd9a   :  { %v2042_v61 = vmul.f32 -1.442695, %v1618_v22  ;;  %v1616_v13 = vpop.f32.mrb[43].mxu1 }
 0xd9b   :  { %v2043_v43 = vmul.f32 -1.442695, %v1619_v12  ;;  %v1745_v12 = vunpack.c.l.bf16 %v3431_v3 }
 0xd9c   :  { %2613 = vpow2.f32 %v2042_v61 }
 0xda6   :  { %v2614_v14 = vpop.eup %2613 }
 0xda7   :  { %v1623_v16 = vadd.f32 1.0, %v2614_v14 }
 0xda9   :  { %2615 = vrcp.f32 %v1623_v16 }
 0xdaa   :  { %2617 = vpow2.f32 %v2043_v43  ;;  %v2046_v43 = vld [vmem:[%s3478_s10] ss:$0 sm:$0xff]  ;;  %s2767_s10 = scalar_lea.vmem %s1957_s0, 1024 }
 0xdab   :  { %p2768_p12 = scmp.ne.s32.totalorder %s1957_s0, %s2767_s10  ;;  %p2773_p0 = scmp.lt.s32.totalorder %s2767_s10, %s2767_s10 }
 0xdad   :  { %p2774_p1 = por %p2773_p0, %p2772_p13 }
 0xdaf   :  { %p2775_p2 = pnand %p2774_p1, %p2768_p12 }
 0xdb3   :  { %v2616_v18 = vpop.eup %2615 }
 0xdb4   :  { %v1635_v19 = vmul.f32 %v2616_v18, %v3399_v28  ;;  %v2618_v46 = vpop.eup %2617 }
 0xdb5   :  { %v1629_v2 = vadd.f32 1.0, %v2618_v46 }
 0xdb6   :  { %v1636_v21 = vpack.c.bf16 %v1635_v19, %v1635_v19 }
 0xdb7   :  { %2619 = vrcp.f32 %v1629_v2 }
 0xdb8   :  { %2411 = vmatmul.mubr.bf16.vlgmr.msra.gmra.mrb[40].mxu0 %v1636_v21 }
 0xdb9   :  { %2415 = vmatpush3.bf16.msra.mxu0 %v2649_v10  ;;  %2430 = vmatprep.mubr.msk.bf16.mxu0 %vm2808_vm0, %v2807_v52 }
 0xdba   :  { %2416 = vmatprep.subr.bf16.mxu0 %v2807_v52 }
 0xdbd   :  { %2417 = vmatpush3.bf16.msra.mxu0 %v2650_v24 }
 0xdbe   :  { %2418 = vmatprep.subr.bf16.mxu0 %v2807_v52 }
 0xdc1   :  { %2419 = vmatpush3.bf16.msra.mxu0 %v2651_v23  ;;  %v2620_v36 = vpop.eup %2619 }
 0xdc2   :  { %2420 = vmatprep.subr.bf16.mxu0 %v2807_v52  ;;  %v1679_v38 = vsub.f32 1.0, %v2620_v36 }
 0xdc4   :  { %v1680_v39 = vmul.f32 %v1679_v38, %v3399_v28 }
 0xdc5   :  { %2421 = vmatpush3.bf16.msra.mxu0 %v2652_v20 }
 0xdc6   :  { %2422 = vmatprep.subr.bf16.mxu0 %v2807_v52 }
 0xdc9   :  { %2423 = vmatpush3.bf16.msra.mxu0 %v2653_v15  ;;  %v1804_v15 = vpack.c.bf16 %v3355_v7, %v3399_v28 }
 0xdca   :  { %2424 = vmatprep.subr.bf16.mxu0 %v2807_v52 }
 0xdcd   :  { %2425 = vmatpush3.bf16.msra.mxu0 %v2654_v31  ;;  %v1805_v31 = vpack.c.bf16 %v3233_v26, %v3279_v5 }
 0xdce   :  { %2426 = vmatprep.subr.bf16.mxu0 %v2807_v52 }
 0xdd1   :  { %2427 = vmatpush3.bf16.msra.mxu0 %v2655_v37  ;;  %v1802_v37 = vld [vmem:[#allocation13 + $0x38] sm:$0xff] }
 0xdd2   :  { %2428 = vmatprep.subr.bf16.mxu0 %v2807_v52 }
 0xdd5   :  { %2429 = vmatpush3.bf16.msra.mxu0 %v2656_v40  ;;  %v1806_v40 = vpack.c.bf16 %v1802_v37, %v3187_v29 }
 0xe8b   :  { %v1671_v4 = vpop.f32.mrb[40].mxu0 }
 0xe8c   :  { %v1677_v9 = vadd.f32 %v1671_v4, %v1634_v6  ;;  %v2412_v25 = vpop.f32.mrb[41].mxu0 }
 0xe8d   :  { %v1674_v27 = vpop.f32.mrb[42].mxu0 }
 0xe8e   :  { %2621 = vtanh.f32 %v1677_v9  ;;  %v2413_v35 = vpop.f32.mrb[43].mxu0 }
 0xe98   :  { %v2622_v52 = vpop.eup %2621 }
 0xe99   :  { %v1681_v41 = vmul.f32 %v2622_v52, %v2620_v36 }
 0xe9b   :  { %v3435_v42 = vadd.f32 %v1681_v41, %v1680_v39 }
 0xe9d   :  { %v1688_v44 = vpack.c.bf16 %v3435_v42, %v3435_v42 }
 0xe9f   :  { %1722 = vmatmul.mubr.bf16.vlgmr.msra.gmra.mrb[44].mxu1 %v1688_v44 }
 0xea0   :  { %2435 = vmatpush3.bf16.msra.mxu1 %v2543_v45 }
 0xea1   :  { %2436 = vmatprep.subr.bf16.mxu1 %v2544_v53 }
 0xea4   :  { %2437 = vmatpush3.bf16.msra.mxu1 %v2544_v53 }
 0xea5   :  { %2438 = vmatprep.subr.bf16.mxu1 %v2545_v0 }
 0xea8   :  { %2439 = vmatpush3.bf16.msra.mxu1 %v2545_v0 }
 0xea9   :  { %2440 = vmatprep.subr.bf16.mxu1 %v2546_v17 }
 0xeac   :  { %2441 = vmatpush3.bf16.msra.mxu1 %v2546_v17 }
 0xead   :  { %2442 = vmatprep.subr.bf16.mxu1 %v2547_v56 }
 0xeb0   :  { %2443 = vmatpush3.bf16.msra.mxu1 %v2547_v56 }
 0xeb1   :  { %2444 = vmatprep.subr.bf16.mxu1 %v2548_v34 }
 0xeb4   :  { %2445 = vmatpush3.bf16.msra.mxu1 %v2548_v34 }
 0xeb5   :  { %2446 = vmatprep.subr.bf16.mxu1 %v2549_v55 }
 0xeb8   :  { %2447 = vmatpush3.bf16.msra.mxu1 %v2549_v55 }
 0xeb9   :  { %2448 = vmatprep.subr.bf16.mxu1 %v2550_v59 }
 0xebc   :  { %2449 = vmatpush3.bf16.msra.mxu1 %v2550_v59 }
 0xf72   :  { %v1723_v48 = vpop.f32.mrb[44].mxu1 }
 0xf73   :  { %v1730_v49 = vadd.f32 %v1723_v48, %v1686_v47  ;;  %v1725_v54 = vpop.f32.mrb[45].mxu1 }
 0xf74   :  { %v1731_v58 = vadd.f32 %v1725_v54, %v1687_v50  ;;  %v1727_v60 = vpop.f32.mrb[46].mxu1 }
 0xf75   :  { %v2044_v62 = vmul.f32 -1.442695, %v1730_v49  ;;  %v1728_v1 = vpop.f32.mrb[47].mxu1 }
 0xf76   :  { %v2045_v32 = vmul.f32 -1.442695, %v1731_v58 }
 0xf77   :  { %2623 = vpow2.f32 %v2044_v62 }
 0xf81   :  { %v2624_v57 = vpop.eup %2623 }
 0xf82   :  { %v1735_v33 = vadd.f32 1.0, %v2624_v57 }
 0xf84   :  { %2625 = vrcp.f32 %v1735_v33 }
 0xf85   :  { %2627 = vpow2.f32 %v2045_v32 }
 0xf8e   :  { %v2626_v51 = vpop.eup %2625 }
 0xf8f   :  { %v1746_v63 = vmul.f32 %v2626_v51, %v3435_v42  ;;  %v2628_v22 = vpop.eup %2627 }
 0xf90   :  { %v1741_v11 = vadd.f32 1.0, %v2628_v22 }
 0xf91   :  { %v1747_v8 = vpack.c.bf16 %v1746_v63, %v1746_v63 }
 0xf92   :  { %2629 = vrcp.f32 %v1741_v11 }
 0xf93   :  { %2431 = vmatmul.mubr.bf16.vlgmr.msra.gmra.mrb[44].mxu0 %v1747_v8 }
 0xf9c   :  { %v2630_v18 = vpop.eup %2629 }
 0xf9d   :  { %v1790_v19 = vsub.f32 1.0, %v2630_v18 }
 0xf9f   :  { %v1791_v10 = vmul.f32 %v1790_v19, %v3435_v42 }
0x1066   :  { %v1782_v30 = vpop.f32.mrb[44].mxu0 }
0x1067   :  { %v1788_v61 = vadd.f32 %v1782_v30, %v1745_v12  ;;  %v2432_v13 = vpop.f32.mrb[45].mxu0 }
0x1068   :  { %v1785_v14 = vpop.f32.mrb[46].mxu0 }
0x1069   :  { %2631 = vtanh.f32 %v1788_v61  ;;  %v2433_v16 = vpop.f32.mrb[47].mxu0 }
0x1073   :  { %v2632_v21 = vpop.eup %2631 }
0x1074   :  { %v1792_v24 = vmul.f32 %v2632_v21, %v2630_v18 }
0x1076   :  { %v1793_v23 = vadd.f32 %v1792_v24, %v1791_v10 }
0x1078   :  { %v1803_v20 = vpack.c.bf16 %v3435_v42, %v1793_v23 }
0x107a   :  { %2450 = vmatprep.mubr.bf16.mxu1 %v1803_v20 }
0x107b   :  { %2451 = vmatmul.mubr.bf16.vlgmr.msra.gmra.mrb[48].mxu1 %v1804_v15 }
0x107c   :  { %2454 = vmatprep.mubr.bf16.mxu1 %v1805_v31 }
0x1083   :  { %2455 = vmatmul.mubr.bf16.gmra.mrb[52].mxu1 %v1806_v40 }
0x114e   :  { %v2452_v46 = vpop.f32.mrb[48].mxu1 }
0x114f   :  { %v1921_v2 = vadd.f32 %v2452_v46, %v2046_v43  ;;  %v1912_v3 = vpop.f32.mrb[49].mxu1 }
0x1150   :  { %v1913_v6 = vadd.f32 %v2046_v43, %v1912_v3  ;;  %v2453_v4 = vpop.f32.mrb[50].mxu1 }
0x1151   :  { %1945 = vst [vmem:[#allocation13 + $0x10] sm:$0xff] %v1921_v2  ;;  %v1924_v7 = vadd.f32 %v2453_v4, %v2046_v43  ;;  %v1915_v28 = vpop.f32.mrb[51].mxu1 }
0x1152   :  { %1943 = vst [vmem:[#allocation13] sm:$0xff] %v1913_v6  ;;  %v1916_v26 = vadd.f32 %v2046_v43, %v1915_v28 }
0x1153   :  { %1946 = vst [vmem:[#allocation13 + $0x18] sm:$0xff] %v1924_v7 }
0x1154   :  { %1944 = vst [vmem:[#allocation13 + $0x8] sm:$0xff] %v1916_v26 }
0x1156   :  { %v2456_v5 = vpop.f32.mrb[52].mxu1 }
0x1157   :  { %v1937_v9 = vadd.f32 %v2456_v5, %v2046_v43  ;;  %v1928_v29 = vpop.f32.mrb[53].mxu1 }
0x1158   :  { %v1929_v25 = vadd.f32 %v2046_v43, %v1928_v29  ;;  %v2457_v27 = vpop.f32.mrb[54].mxu1 }
0x1159   :  { %1949 = vst [vmem:[#allocation13 + $0x30] sm:$0xff] %v1937_v9  ;;  %v1940_v35 = vadd.f32 %v2457_v27, %v2046_v43  ;;  %v1931_v36 = vpop.f32.mrb[55].mxu1 }
0x115a   :  { %1947 = vst [vmem:[#allocation13 + $0x20] sm:$0xff] %v1929_v25  ;;  %v1932_v38 = vadd.f32 %v2046_v43, %v1931_v36 }
0x115b   :  { %1950 = vst [vmem:[#allocation13 + $0x38] sm:$0xff] %v1940_v35 }
0x115c   :  { %1948 = vst [vmem:[#allocation13 + $0x28] sm:$0xff] %v1932_v38 }
0x115d   :  { %2778 = shalt.err (!%p2775_p2)
}
0x115e   :  { %s2779_s17 = scalar_lea.hbm %s3479_s11, 1024 }
0x115f   :  { %p2780_p3 = scmp.ne.s32.totalorder %s3479_s11, %s2779_s17  ;;  %p2783_p4 = scmp.lt.u32.totalorder %s2779_s17, %s3479_s11 }
0x1161   :  { %p2785_p5 = pnand %p2783_p4, %p2780_p3 }
0x1163   :  { %2788 = shalt.err (!%p2785_p5)
}
0x1164   :  { %1962 = dma.vmem_to_hbm [thread:$0]  %s1957_s0, 1024, %s3479_s11, [#allocation6], %s2799_s29, %s2799_s29, %s2800_s30  }
0x1165   :  { %2795 = dma.done.wait [#allocation6], 1024  }
0x1166   :  { %2796 = vsyncadd [#allocation6], 4294966272 }
0x1167   :  { %1966 = vsyncpa [#allocation5], 1 }
0x1168   :  { %1967 = vsyncpa [#allocation8], 1 }
0x1169   :  { %1968 = vsyncpa [#allocation11], 1 }
0x116a   :  { %1969 = vsyncpa [#allocation6], 1 }

</bundles_post_ra>
